<compile_context>
chip_gen: v7x
topology: tpu7x:2x2x1
jax: 0.10.0
libtpu: 0.0.40
codegen_flags: <defaults>
</compile_context>

<pallas_src>
import functools

import jax
import jax.numpy as jnp
from jax.experimental import pallas as pl
from jax.experimental.pallas import tpu as pltpu


def _conv_strip(x_ref, wtaps, r0, rows, *, stride, w_out, c):
    """Depthwise 3x3 conv for output rows [r0, r0+rows) of the current image.

    x_ref block: (1, hp, wp, c) (already halo-padded).  Returns f32
    (rows, w_out, c).  No strided ref indexing: one contiguous load, then
    static value-level slices (stride-2 W deinterleave done once per kh and
    reused across the 3 kw taps).
    """
    span = stride * (rows - 1) + 3
    blk = x_ref[0, pl.ds(stride * r0, span), :, :].astype(jnp.float32)

    acc = jnp.zeros((rows, w_out, c), jnp.float32)
    for kh in range(3):
        if stride == 1:
            rows_kh = blk[kh:kh + rows]                       # (rows, wp, c)
            wins = [rows_kh[:, kw:kw + w_out, :] for kw in range(3)]
        else:  # stride == 2: deinterleave even/odd columns once, reuse 3x
            rows_kh = blk[kh:kh + 2 * (rows - 1) + 1:2]       # (rows, wp, c)
            ev = rows_kh[:, 0::2, :]                          # even input cols
            od = rows_kh[:, 1::2, :]                          # odd input cols
            wins = [ev[:, :w_out, :],                         # kw = 0
                    od[:, :w_out, :],                         # kw = 1
                    ev[:, 1:1 + w_out, :]]                    # kw = 2
        for kw in range(3):
            acc = acc + wins[kw] * wtaps[kh][kw]
    return acc


def _conv_dw_kernel(x_ref, w_ref, g_ref, b_ref, o_ref,
                    y_ref, sum_ref, ssq_ref, scale_ref, shift_ref,
                    *, stride, h_out, w_out, count, eps, row_strip, keep_y):
    """Grid = (channel_tile, phase, batch).

    phase 0: depthwise conv (per image); accumulate per-channel sum / ssq for
             BN batch stats; if keep_y, stash conv output in VMEM.
    phase 1: (i==0) fold stats into scale/shift once; then normalize + ReLU
             and write the output.  If not keep_y, the conv is recomputed.
    """
    phase = pl.program_id(1)
    i = pl.program_id(2)                       # batch index
    c = o_ref.shape[-1]                        # channel tile (128 lanes)

    def load_taps():
        # Hoisted: 9 weight taps, loaded + cast to f32 once per invocation.
        return [[w_ref[kh, kw, :].astype(jnp.float32).reshape(1, 1, c)
                 for kw in range(3)] for kh in range(3)]

    # ---------------- phase 0: conv + stats ----------------
    @pl.when(phase == 0)
    def _phase0():
        @pl.when(i == 0)
        def _():
            sum_ref[...] = jnp.zeros_like(sum_ref)
            ssq_ref[...] = jnp.zeros_like(ssq_ref)

        wtaps = load_taps()
        part_sum = jnp.zeros((w_out, c), jnp.float32)   # register partials
        part_ssq = jnp.zeros((w_out, c), jnp.float32)
        for r0 in range(0, h_out, row_strip):
            rows = min(row_strip, h_out - r0)
            acc = _conv_strip(x_ref, wtaps, r0, rows,
                              stride=stride, w_out=w_out, c=c)
            if keep_y:
                y_ref[pl.ds(i, 1), pl.ds(r0, rows), :, :] = acc.reshape(
                    1, rows, w_out, c)
            part_sum = part_sum + jnp.sum(acc, axis=0)          # VALU only
            part_ssq = part_ssq + jnp.sum(acc * acc, axis=0)
        # one cross-sublane (XLU) reduce + one VMEM RMW per image
        sum_ref[...] += jnp.sum(part_sum, axis=0).reshape(1, c)
        ssq_ref[...] += jnp.sum(part_ssq, axis=0).reshape(1, c)

    # ---------------- phase 1: BN (batch stats) + ReLU ----------------
    @pl.when(phase == 1)
    def _phase1():
        @pl.when(i == 0)                        # fold stats once
        def _():
            inv_count = 1.0 / count
            mean = sum_ref[...] * inv_count                 # (1, C)
            # NOTE: E[x^2]-E[x]^2 with clamp; adequate here (f32 accum), but a
            # two-pass variance would be safer for huge-magnitude activations.
            var = ssq_ref[...] * inv_count - mean * mean
            var = jnp.maximum(var, 0.0)
            inv = jax.lax.rsqrt(var + eps)
            scale_ref[...] = g_ref[...] * inv
            shift_ref[...] = b_ref[...] - g_ref[...] * inv * mean

        if keep_y:
            scale = scale_ref[...].reshape(1, 1, 1, c)
            shift = shift_ref[...].reshape(1, 1, 1, c)
            y = y_ref[pl.ds(i, 1), :, :, :]                 # (1, Ho, Wo, C)
            o_ref[...] = jnp.maximum(y * scale + shift, 0.0).astype(o_ref.dtype)
        else:
            # HBM-friendly fallback: recompute the conv instead of keeping a
            # batch-resident VMEM intermediate.
            wtaps = load_taps()
            scale = scale_ref[...].reshape(1, 1, c)
            shift = shift_ref[...].reshape(1, 1, c)
            for r0 in range(0, h_out, row_strip):
                rows = min(row_strip, h_out - r0)
                acc = _conv_strip(x_ref, wtaps, r0, rows,
                                  stride=stride, w_out=w_out, c=c)
                val = jnp.maximum(acc * scale + shift, 0.0).astype(o_ref.dtype)
                o_ref[pl.ds(0, 1), pl.ds(r0, rows), :, :] = val.reshape(
                    1, rows, w_out, c)


def conv_dw_forward(x_nchw, weight, gamma, beta, *, stride=1, eps=1e-5,
                    force_recompute=False):
    """x_nchw: (N, C, H, W); weight: (C, 1, 3, 3) depthwise; gamma/beta: (C,)."""
    nb, c, h, w = x_nchw.shape
    h_out = (h + 2 - 3) // stride + 1
    w_out = (w + 2 - 3) // stride + 1

    # ---- layout glue: NCHW -> NHWC, pad channels to a 128-lane multiple ----
    c_tile = 128
    c_pad = ((c + c_tile - 1) // c_tile) * c_tile
    n_ct = c_pad // c_tile

    x = jnp.transpose(x_nchw, (0, 2, 3, 1))                       # NHWC
    x = jnp.pad(x, ((0, 0), (1, 1), (1, 1), (0, c_pad - c)))      # halo pad=1
    w_hwc = jnp.transpose(weight[:, 0, :, :], (1, 2, 0))          # (3, 3, C)
    w_hwc = jnp.pad(w_hwc, ((0, 0), (0, 0), (0, c_pad - c)))
    g2 = jnp.pad(gamma.astype(jnp.float32), (0, c_pad - c)).reshape(1, c_pad)
    b2 = jnp.pad(beta.astype(jnp.float32), (0, c_pad - c)).reshape(1, c_pad)

    hp, wp = h + 2, w + 2
    count = float(nb * h_out * w_out)

    # vreg-aware strip sizing: f32 acc uses rows * ceil(w_out/8) vregs.
    w_vregs = max(1, (w_out + 7) // 8)
    row_strip = max(1, min(h_out, 16 // w_vregs))

    # ---- generation-aware VMEM budgeting ----
    try:
        vmem_cap = int(getattr(pltpu.get_tpu_info(), "vmem_capacity_bytes",
                               64 * 2 ** 20))
    except Exception:  # interpret mode / no TPU info available
        vmem_cap = 64 * 2 ** 20          # conservative: v7x per-TensorCore
    budget = int(0.75 * vmem_cap)        # headroom for Mosaic internals

    itemsize = jnp.dtype(x_nchw.dtype).itemsize
    in_blk = hp * wp * c_tile * itemsize
    out_blk = h_out * w_out * c_tile * itemsize
    y_bytes = nb * h_out * w_out * c_tile * 4
    pipe_bytes = 2 * in_blk + 2 * out_blk + 8 * c_tile * 4 + (1 << 16)

    keep_y = (not force_recompute) and (y_bytes + pipe_bytes <= budget)
    y_scratch_shape = (nb, h_out, w_out, c_tile) if keep_y else (1, 1, 1, c_tile)
    needed = pipe_bytes + (y_bytes if keep_y else 0)
    vmem_limit = int(min(budget, max(32 * 2 ** 20, needed + 4 * 2 ** 20)))

    kernel = functools.partial(
        _conv_dw_kernel, stride=stride, h_out=h_out, w_out=w_out,
        count=count, eps=float(eps), row_strip=row_strip, keep_y=keep_y)

    if keep_y:
        # phase 1 never touches x: pin the input block index so no extra DMA.
        x_index = lambda ct, p, i: (i * (1 - p) + (nb - 1) * p, 0, 0, ct)
    else:
        # phase 1 recomputes the conv: needs image i's input block again.
        x_index = lambda ct, p, i: (i, 0, 0, ct)

    out_nhwc = pl.pallas_call(
        kernel,
        out_shape=jax.ShapeDtypeStruct((nb, h_out, w_out, c_pad), x_nchw.dtype),
        grid_spec=pltpu.PrefetchScalarGridSpec(
            num_scalar_prefetch=0,
            grid=(n_ct, 2, nb),            # (channel tile, phase, batch)
            in_specs=[
                pl.BlockSpec((1, hp, wp, c_tile), x_index),
                pl.BlockSpec((3, 3, c_tile), lambda ct, p, i: (0, 0, ct)),
                pl.BlockSpec((1, c_tile), lambda ct, p, i: (0, ct)),
                pl.BlockSpec((1, c_tile), lambda ct, p, i: (0, ct)),
            ],
            # output: pinned to block 0 during phase 0 (never left until it is
            # fully written at phase 1 / i==0 -> no garbage write-backs).
            out_specs=pl.BlockSpec((1, h_out, w_out, c_tile),
                                   lambda ct, p, i: (i * p, 0, 0, ct)),
            scratch_shapes=[
                pltpu.VMEM(y_scratch_shape, jnp.float32),   # conv intermediate
                pltpu.VMEM((1, c_tile), jnp.float32),       # per-channel sum
                pltpu.VMEM((1, c_tile), jnp.float32),       # per-channel ssq
                pltpu.VMEM((1, c_tile), jnp.float32),       # BN scale
                pltpu.VMEM((1, c_tile), jnp.float32),       # BN shift
            ],
        ),
        compiler_params=pltpu.CompilerParams(
            dimension_semantics=("parallel", "arbitrary", "arbitrary"),
            vmem_limit_bytes=vmem_limit),
    )(x, w_hwc, g2, b2)

    return jnp.transpose(out_nhwc[..., :c], (0, 3, 1, 2))         # back to NCHW


def _reference(x, weight, gamma, beta, stride, eps):
    """Pure-JAX reference matching PyTorch conv_dw.forward (BN in train mode)."""
    y = jax.lax.conv_general_dilated(
        x, weight, window_strides=(stride, stride), padding=((1, 1), (1, 1)),
        dimension_numbers=("NCHW", "OIHW", "NCHW"),
        feature_group_count=x.shape[1])
    mean = jnp.mean(y, axis=(0, 2, 3), keepdims=True)
    var = jnp.mean((y - mean) ** 2, axis=(0, 2, 3), keepdims=True)
    yhat = (y - mean) / jnp.sqrt(var + eps)
    yhat = yhat * gamma.reshape(1, -1, 1, 1) + beta.reshape(1, -1, 1, 1)
    return jnp.maximum(yhat, 0.0)


if __name__ == "__main__":
    key = jax.random.PRNGKey(0)

    def run_case(n, c, h, w, stride, force_recompute=False):
        kx, kw_ = jax.random.split(jax.random.fold_in(key, c * 1000 + stride))
        x = jax.random.normal(kx, (n, c, h, w), dtype=jnp.float32)
        weight = 0.1 * jax.random.normal(kw_, (c, 1, 3, 3), dtype=jnp.float32)
        gamma = 1.0 + 0.1 * jnp.arange(c, dtype=jnp.float32)
        beta = 0.01 * jnp.arange(c, dtype=jnp.float32)

        out = conv_dw_forward(x, weight, gamma, beta, stride=stride,
                              force_recompute=force_recompute)
        out = jax.block_until_ready(out)

        ref = _reference(x, weight, gamma, beta, stride, 1e-5)
        assert out.shape == ref.shape, (out.shape, ref.shape)
        err = float(jnp.max(jnp.abs(out - ref)))
        assert jnp.allclose(out, ref, atol=1e-3, rtol=1e-3), (
            f"mismatch (N={n},C={c},H={h},W={w},stride={stride},"
            f"recompute={force_recompute}): max_err={err}")

    run_case(2, 8, 16, 16, 1)    # C < 128 (lane padding), stride 1
    run_case(2, 8, 16, 16, 2)    # stride-2 (in-register even/odd deinterleave)
    run_case(2, 160, 8, 8, 1)    # two 128-channel tiles (parallel ct axis)
    run_case(2, 8, 16, 16, 1, force_recompute=True)   # VMEM-spill fallback
    run_case(1, 8, 12, 12, 2, force_recompute=True)   # fallback + stride 2

    print("KERNEL_OK")
</pallas_src>

<mosaic_0001>
module attributes {stable_mosaic.version = 11 : i64} {
  func.func @_conv_dw_kernel(%arg0: i32, %arg1: i32, %arg2: i32, %arg3: memref<1x18x18x128xf32, #tpu.memory_space<vmem>>, %arg4: memref<3x3x128xf32, #tpu.memory_space<vmem>>, %arg5: memref<1x128xf32, #tpu.memory_space<vmem>>, %arg6: memref<1x128xf32, #tpu.memory_space<vmem>>, %arg7: memref<1x16x16x128xf32, #tpu.memory_space<vmem>>, %arg8: memref<2x16x16x128xf32, #tpu.memory_space<vmem>>, %arg9: memref<1x128xf32, #tpu.memory_space<vmem>>, %arg10: memref<1x128xf32, #tpu.memory_space<vmem>>, %arg11: memref<1x128xf32, #tpu.memory_space<vmem>>, %arg12: memref<1x128xf32, #tpu.memory_space<vmem>>) attributes {dimension_semantics = [#tpu.dimension_semantics<parallel>, #tpu.dimension_semantics<arbitrary>, #tpu.dimension_semantics<arbitrary>], iteration_bounds = array<i64: 1, 2, 2>, scalar_prefetch = 0 : i64, scratch_operands = 5 : i64, tpu.core_type = #tpu.core_type<tc>, window_params = [{transform_indices = @transform_0, window_bounds = array<i64: 1, 18, 18, 128>}, {transform_indices = @transform_1, window_bounds = array<i64: 3, 3, 128>}, {transform_indices = @transform_2, window_bounds = array<i64: 1, 128>}, {transform_indices = @transform_3, window_bounds = array<i64: 1, 128>}, {transform_indices = @transform_4, window_bounds = array<i64: 1, 16, 16, 128>}]} {
    %c0_i32 = arith.constant 0 : i32
    %0 = arith.cmpi eq, %arg1, %c0_i32 : i32
    %1 = arith.extui %0 : i1 to i32
    %c0_i32_0 = arith.constant 0 : i32
    %2 = arith.cmpi ne, %1, %c0_i32_0 : i32
    scf.if %2 {
      %c0_i32_2 = arith.constant 0 : i32
      %6 = arith.cmpi eq, %arg2, %c0_i32_2 : i32
      %7 = arith.extui %6 : i1 to i32
      %c0_i32_3 = arith.constant 0 : i32
      %8 = arith.cmpi ne, %7, %c0_i32_3 : i32
      scf.if %8 {
        %cst_58 = arith.constant 0.000000e+00 : f32
        %148 = vector.broadcast %cst_58 : f32 to vector<1x128xf32>
        %c0_59 = arith.constant 0 : index
        %c0_60 = arith.constant 0 : index
        %149 = vector.load %arg9[%c0_59, %c0_60] : memref<1x128xf32, #tpu.memory_space<vmem>>, vector<1x128xf32>
        tpu.vector_store %arg9[%c0_59, %c0_60], %148 {strides = array<i32>} : memref<1x128xf32, #tpu.memory_space<vmem>>, vector<1x128xf32>,
        %cst_61 = arith.constant 0.000000e+00 : f32
        %150 = vector.broadcast %cst_61 : f32 to vector<1x128xf32>
        %c0_62 = arith.constant 0 : index
        %c0_63 = arith.constant 0 : index
        %151 = vector.load %arg10[%c0_62, %c0_63] : memref<1x128xf32, #tpu.memory_space<vmem>>, vector<1x128xf32>
        tpu.vector_store %arg10[%c0_62, %c0_63], %150 {strides = array<i32>} : memref<1x128xf32, #tpu.memory_space<vmem>>, vector<1x128xf32>,
      } else {
      }
      %c0 = arith.constant 0 : index
      %c0_4 = arith.constant 0 : index
      %c0_5 = arith.constant 0 : index
      %9 = vector.load %arg4[%c0, %c0_4, %c0_5] : memref<3x3x128xf32, #tpu.memory_space<vmem>>, vector<1x1x128xf32>
      %10 = vector.shape_cast %9 : vector<1x1x128xf32> to vector<128xf32>
      %11 = vector.shape_cast %10 : vector<128xf32> to vector<1x1x128xf32>
      %c0_6 = arith.constant 0 : index
      %c1 = arith.constant 1 : index
      %c0_7 = arith.constant 0 : index
      %12 = vector.load %arg4[%c0_6, %c1, %c0_7] : memref<3x3x128xf32, #tpu.memory_space<vmem>>, vector<1x1x128xf32>
      %13 = vector.shape_cast %12 : vector<1x1x128xf32> to vector<128xf32>
      %14 = vector.shape_cast %13 : vector<128xf32> to vector<1x1x128xf32>
      %c0_8 = arith.constant 0 : index
      %c2 = arith.constant 2 : index
      %c0_9 = arith.constant 0 : index
      %15 = vector.load %arg4[%c0_8, %c2, %c0_9] : memref<3x3x128xf32, #tpu.memory_space<vmem>>, vector<1x1x128xf32>
      %16 = vector.shape_cast %15 : vector<1x1x128xf32> to vector<128xf32>
      %17 = vector.shape_cast %16 : vector<128xf32> to vector<1x1x128xf32>
      %c1_10 = arith.constant 1 : index
      %c0_11 = arith.constant 0 : index
      %c0_12 = arith.constant 0 : index
      %18 = vector.load %arg4[%c1_10, %c0_11, %c0_12] : memref<3x3x128xf32, #tpu.memory_space<vmem>>, vector<1x1x128xf32>
      %19 = vector.shape_cast %18 : vector<1x1x128xf32> to vector<128xf32>
      %20 = vector.shape_cast %19 : vector<128xf32> to vector<1x1x128xf32>
      %c1_13 = arith.constant 1 : index
      %c1_14 = arith.constant 1 : index
      %c0_15 = arith.constant 0 : index
      %21 = vector.load %arg4[%c1_13, %c1_14, %c0_15] : memref<3x3x128xf32, #tpu.memory_space<vmem>>, vector<1x1x128xf32>
      %22 = vector.shape_cast %21 : vector<1x1x128xf32> to vector<128xf32>
      %23 = vector.shape_cast %22 : vector<128xf32> to vector<1x1x128xf32>
      %c1_16 = arith.constant 1 : index
      %c2_17 = arith.constant 2 : index
      %c0_18 = arith.constant 0 : index
      %24 = vector.load %arg4[%c1_16, %c2_17, %c0_18] : memref<3x3x128xf32, #tpu.memory_space<vmem>>, vector<1x1x128xf32>
      %25 = vector.shape_cast %24 : vector<1x1x128xf32> to vector<128xf32>
      %26 = vector.shape_cast %25 : vector<128xf32> to vector<1x1x128xf32>
      %c2_19 = arith.constant 2 : index
      %c0_20 = arith.constant 0 : index
      %c0_21 = arith.constant 0 : index
      %27 = vector.load %arg4[%c2_19, %c0_20, %c0_21] : memref<3x3x128xf32, #tpu.memory_space<vmem>>, vector<1x1x128xf32>
      %28 = vector.shape_cast %27 : vector<1x1x128xf32> to vector<128xf32>
      %29 = vector.shape_cast %28 : vector<128xf32> to vector<1x1x128xf32>
      %c2_22 = arith.constant 2 : index
      %c1_23 = arith.constant 1 : index
      %c0_24 = arith.constant 0 : index
      %30 = vector.load %arg4[%c2_22, %c1_23, %c0_24] : memref<3x3x128xf32, #tpu.memory_space<vmem>>, vector<1x1x128xf32>
      %31 = vector.shape_cast %30 : vector<1x1x128xf32> to vector<128xf32>
      %32 = vector.shape_cast %31 : vector<128xf32> to vector<1x1x128xf32>
      %c2_25 = arith.constant 2 : index
      %c2_26 = arith.constant 2 : index
      %c0_27 = arith.constant 0 : index
      %33 = vector.load %arg4[%c2_25, %c2_26, %c0_27] : memref<3x3x128xf32, #tpu.memory_space<vmem>>, vector<1x1x128xf32>
      %34 = vector.shape_cast %33 : vector<1x1x128xf32> to vector<128xf32>
      %35 = vector.shape_cast %34 : vector<128xf32> to vector<1x1x128xf32>
      %cst = arith.constant 0.000000e+00 : f32
      %36 = vector.broadcast %cst : f32 to vector<16x128xf32>
      %cst_28 = arith.constant 0.000000e+00 : f32
      %37 = vector.broadcast %cst_28 : f32 to vector<16x128xf32>
      %c0_29 = arith.constant 0 : index
      %c0_30 = arith.constant 0 : index
      %c0_31 = arith.constant 0 : index
      %c0_32 = arith.constant 0 : index
      %38 = vector.load %arg3[%c0_29, %c0_30, %c0_31, %c0_32] : memref<1x18x18x128xf32, #tpu.memory_space<vmem>>, vector<1x10x18x128xf32>
      %39 = vector.shape_cast %38 : vector<1x10x18x128xf32> to vector<10x18x128xf32>
      %cst_33 = arith.constant 0.000000e+00 : f32
      %40 = vector.broadcast %cst_33 : f32 to vector<8x16x128xf32>
      %41 = vector.extract_strided_slice %39 {offsets = [0, 0, 0], sizes = [8, 18, 128], strides = [1, 1, 1]} : vector<10x18x128xf32> to vector<8x18x128xf32>
      %42 = vector.extract_strided_slice %41 {offsets = [0, 0, 0], sizes = [8, 16, 128], strides = [1, 1, 1]} : vector<8x18x128xf32> to vector<8x16x128xf32>
      %43 = vector.extract_strided_slice %41 {offsets = [0, 1, 0], sizes = [8, 16, 128], strides = [1, 1, 1]} : vector<8x18x128xf32> to vector<8x16x128xf32>
      %44 = vector.extract_strided_slice %41 {offsets = [0, 2, 0], sizes = [8, 16, 128], strides = [1, 1, 1]} : vector<8x18x128xf32> to vector<8x16x128xf32>
      %45 = vector.broadcast %11 : vector<1x1x128xf32> to vector<8x16x128xf32>
      %46 = arith.mulf %42, %45 : vector<8x16x128xf32>
      %47 = arith.addf %40, %46 : vector<8x16x128xf32>
      %48 = vector.broadcast %14 : vector<1x1x128xf32> to vector<8x16x128xf32>
      %49 = arith.mulf %43, %48 : vector<8x16x128xf32>
      %50 = arith.addf %47, %49 : vector<8x16x128xf32>
      %51 = vector.broadcast %17 : vector<1x1x128xf32> to vector<8x16x128xf32>
      %52 = arith.mulf %44, %51 : vector<8x16x128xf32>
      %53 = arith.addf %50, %52 : vector<8x16x128xf32>
      %54 = vector.extract_strided_slice %39 {offsets = [1, 0, 0], sizes = [8, 18, 128], strides = [1, 1, 1]} : vector<10x18x128xf32> to vector<8x18x128xf32>
      %55 = vector.extract_strided_slice %54 {offsets = [0, 0, 0], sizes = [8, 16, 128], strides = [1, 1, 1]} : vector<8x18x128xf32> to vector<8x16x128xf32>
      %56 = vector.extract_strided_slice %54 {offsets = [0, 1, 0], sizes = [8, 16, 128], strides = [1, 1, 1]} : vector<8x18x128xf32> to vector<8x16x128xf32>
      %57 = vector.extract_strided_slice %54 {offsets = [0, 2, 0], sizes = [8, 16, 128], strides = [1, 1, 1]} : vector<8x18x128xf32> to vector<8x16x128xf32>
      %58 = vector.broadcast %20 : vector<1x1x128xf32> to vector<8x16x128xf32>
      %59 = arith.mulf %55, %58 : vector<8x16x128xf32>
      %60 = arith.addf %53, %59 : vector<8x16x128xf32>
      %61 = vector.broadcast %23 : vector<1x1x128xf32> to vector<8x16x128xf32>
      %62 = arith.mulf %56, %61 : vector<8x16x128xf32>
      %63 = arith.addf %60, %62 : vector<8x16x128xf32>
      %64 = vector.broadcast %26 : vector<1x1x128xf32> to vector<8x16x128xf32>
      %65 = arith.mulf %57, %64 : vector<8x16x128xf32>
      %66 = arith.addf %63, %65 : vector<8x16x128xf32>
      %67 = vector.extract_strided_slice %39 {offsets = [2, 0, 0], sizes = [8, 18, 128], strides = [1, 1, 1]} : vector<10x18x128xf32> to vector<8x18x128xf32>
      %68 = vector.extract_strided_slice %67 {offsets = [0, 0, 0], sizes = [8, 16, 128], strides = [1, 1, 1]} : vector<8x18x128xf32> to vector<8x16x128xf32>
      %69 = vector.extract_strided_slice %67 {offsets = [0, 1, 0], sizes = [8, 16, 128], strides = [1, 1, 1]} : vector<8x18x128xf32> to vector<8x16x128xf32>
      %70 = vector.extract_strided_slice %67 {offsets = [0, 2, 0], sizes = [8, 16, 128], strides = [1, 1, 1]} : vector<8x18x128xf32> to vector<8x16x128xf32>
      %71 = vector.broadcast %29 : vector<1x1x128xf32> to vector<8x16x128xf32>
      %72 = arith.mulf %68, %71 : vector<8x16x128xf32>
      %73 = arith.addf %66, %72 : vector<8x16x128xf32>
      %74 = vector.broadcast %32 : vector<1x1x128xf32> to vector<8x16x128xf32>
      %75 = arith.mulf %69, %74 : vector<8x16x128xf32>
      %76 = arith.addf %73, %75 : vector<8x16x128xf32>
      %77 = vector.broadcast %35 : vector<1x1x128xf32> to vector<8x16x128xf32>
      %78 = arith.mulf %70, %77 : vector<8x16x128xf32>
      %79 = arith.addf %76, %78 : vector<8x16x128xf32>
      %80 = vector.shape_cast %79 : vector<8x16x128xf32> to vector<1x8x16x128xf32>
      %81 = arith.index_cast %arg2 : i32 to index
      %c0_34 = arith.constant 0 : index
      %c0_35 = arith.constant 0 : index
      %c0_36 = arith.constant 0 : index
      %82 = vector.load %arg8[%81, %c0_34, %c0_35, %c0_36] : memref<2x16x16x128xf32, #tpu.memory_space<vmem>>, vector<1x8x16x128xf32>
      tpu.vector_store %arg8[%81, %c0_34, %c0_35, %c0_36], %80 {strides = array<i32>} : memref<2x16x16x128xf32, #tpu.memory_space<vmem>>, vector<1x8x16x128xf32>,
      %cst_37 = arith.constant dense<0.000000e+00> : vector<16x128xf32>
      %83 = vector.multi_reduction <add>, %79, %cst_37 [0] : vector<8x16x128xf32> to vector<16x128xf32>
      %84 = arith.addf %36, %83 : vector<16x128xf32>
      %85 = arith.mulf %79, %79 : vector<8x16x128xf32>
      %cst_38 = arith.constant dense<0.000000e+00> : vector<16x128xf32>
      %86 = vector.multi_reduction <add>, %85, %cst_38 [0] : vector<8x16x128xf32> to vector<16x128xf32>
      %87 = arith.addf %37, %86 : vector<16x128xf32>
      %c0_39 = arith.constant 0 : index
      %c8 = arith.constant 8 : index
      %c0_40 = arith.constant 0 : index
      %c0_41 = arith.constant 0 : index
      %88 = vector.load %arg3[%c0_39, %c8, %c0_40, %c0_41] : memref<1x18x18x128xf32, #tpu.memory_space<vmem>>, vector<1x10x18x128xf32>
      %89 = vector.shape_cast %88 : vector<1x10x18x128xf32> to vector<10x18x128xf32>
      %cst_42 = arith.constant 0.000000e+00 : f32
      %90 = vector.broadcast %cst_42 : f32 to vector<8x16x128xf32>
      %91 = vector.extract_strided_slice %89 {offsets = [0, 0, 0], sizes = [8, 18, 128], strides = [1, 1, 1]} : vector<10x18x128xf32> to vector<8x18x128xf32>
      %92 = vector.extract_strided_slice %91 {offsets = [0, 0, 0], sizes = [8, 16, 128], strides = [1, 1, 1]} : vector<8x18x128xf32> to vector<8x16x128xf32>
      %93 = vector.extract_strided_slice %91 {offsets = [0, 1, 0], sizes = [8, 16, 128], strides = [1, 1, 1]} : vector<8x18x128xf32> to vector<8x16x128xf32>
      %94 = vector.extract_strided_slice %91 {offsets = [0, 2, 0], sizes = [8, 16, 128], strides = [1, 1, 1]} : vector<8x18x128xf32> to vector<8x16x128xf32>
      %95 = vector.broadcast %11 : vector<1x1x128xf32> to vector<8x16x128xf32>
      %96 = arith.mulf %92, %95 : vector<8x16x128xf32>
      %97 = arith.addf %90, %96 : vector<8x16x128xf32>
      %98 = vector.broadcast %14 : vector<1x1x128xf32> to vector<8x16x128xf32>
      %99 = arith.mulf %93, %98 : vector<8x16x128xf32>
      %100 = arith.addf %97, %99 : vector<8x16x128xf32>
      %101 = vector.broadcast %17 : vector<1x1x128xf32> to vector<8x16x128xf32>
      %102 = arith.mulf %94, %101 : vector<8x16x128xf32>
      %103 = arith.addf %100, %102 : vector<8x16x128xf32>
      %104 = vector.extract_strided_slice %89 {offsets = [1, 0, 0], sizes = [8, 18, 128], strides = [1, 1, 1]} : vector<10x18x128xf32> to vector<8x18x128xf32>
      %105 = vector.extract_strided_slice %104 {offsets = [0, 0, 0], sizes = [8, 16, 128], strides = [1, 1, 1]} : vector<8x18x128xf32> to vector<8x16x128xf32>
      %106 = vector.extract_strided_slice %104 {offsets = [0, 1, 0], sizes = [8, 16, 128], strides = [1, 1, 1]} : vector<8x18x128xf32> to vector<8x16x128xf32>
      %107 = vector.extract_strided_slice %104 {offsets = [0, 2, 0], sizes = [8, 16, 128], strides = [1, 1, 1]} : vector<8x18x128xf32> to vector<8x16x128xf32>
      %108 = vector.broadcast %20 : vector<1x1x128xf32> to vector<8x16x128xf32>
      %109 = arith.mulf %105, %108 : vector<8x16x128xf32>
      %110 = arith.addf %103, %109 : vector<8x16x128xf32>
      %111 = vector.broadcast %23 : vector<1x1x128xf32> to vector<8x16x128xf32>
      %112 = arith.mulf %106, %111 : vector<8x16x128xf32>
      %113 = arith.addf %110, %112 : vector<8x16x128xf32>
      %114 = vector.broadcast %26 : vector<1x1x128xf32> to vector<8x16x128xf32>
      %115 = arith.mulf %107, %114 : vector<8x16x128xf32>
      %116 = arith.addf %113, %115 : vector<8x16x128xf32>
      %117 = vector.extract_strided_slice %89 {offsets = [2, 0, 0], sizes = [8, 18, 128], strides = [1, 1, 1]} : vector<10x18x128xf32> to vector<8x18x128xf32>
      %118 = vector.extract_strided_slice %117 {offsets = [0, 0, 0], sizes = [8, 16, 128], strides = [1, 1, 1]} : vector<8x18x128xf32> to vector<8x16x128xf32>
      %119 = vector.extract_strided_slice %117 {offsets = [0, 1, 0], sizes = [8, 16, 128], strides = [1, 1, 1]} : vector<8x18x128xf32> to vector<8x16x128xf32>
      %120 = vector.extract_strided_slice %117 {offsets = [0, 2, 0], sizes = [8, 16, 128], strides = [1, 1, 1]} : vector<8x18x128xf32> to vector<8x16x128xf32>
      %121 = vector.broadcast %29 : vector<1x1x128xf32> to vector<8x16x128xf32>
      %122 = arith.mulf %118, %121 : vector<8x16x128xf32>
      %123 = arith.addf %116, %122 : vector<8x16x128xf32>
      %124 = vector.broadcast %32 : vector<1x1x128xf32> to vector<8x16x128xf32>
      %125 = arith.mulf %119, %124 : vector<8x16x128xf32>
      %126 = arith.addf %123, %125 : vector<8x16x128xf32>
      %127 = vector.broadcast %35 : vector<1x1x128xf32> to vector<8x16x128xf32>
      %128 = arith.mulf %120, %127 : vector<8x16x128xf32>
      %129 = arith.addf %126, %128 : vector<8x16x128xf32>
      %130 = vector.shape_cast %129 : vector<8x16x128xf32> to vector<1x8x16x128xf32>
      %131 = arith.index_cast %arg2 : i32 to index
      %c8_43 = arith.constant 8 : index
      %c0_44 = arith.constant 0 : index
      %c0_45 = arith.constant 0 : index
      %132 = vector.load %arg8[%131, %c8_43, %c0_44, %c0_45] : memref<2x16x16x128xf32, #tpu.memory_space<vmem>>, vector<1x8x16x128xf32>
      tpu.vector_store %arg8[%131, %c8_43, %c0_44, %c0_45], %130 {strides = array<i32>} : memref<2x16x16x128xf32, #tpu.memory_space<vmem>>, vector<1x8x16x128xf32>,
      %cst_46 = arith.constant dense<0.000000e+00> : vector<16x128xf32>
      %133 = vector.multi_reduction <add>, %129, %cst_46 [0] : vector<8x16x128xf32> to vector<16x128xf32>
      %134 = arith.addf %84, %133 : vector<16x128xf32>
      %135 = arith.mulf %129, %129 : vector<8x16x128xf32>
      %cst_47 = arith.constant dense<0.000000e+00> : vector<16x128xf32>
      %136 = vector.multi_reduction <add>, %135, %cst_47 [0] : vector<8x16x128xf32> to vector<16x128xf32>
      %137 = arith.addf %87, %136 : vector<16x128xf32>
      %c0_48 = arith.constant 0 : index
      %c0_49 = arith.constant 0 : index
      %138 = vector.load %arg9[%c0_48, %c0_49] : memref<1x128xf32, #tpu.memory_space<vmem>>, vector<1x128xf32>
      %cst_50 = arith.constant dense<0.000000e+00> : vector<128xf32>
      %139 = vector.multi_reduction <add>, %134, %cst_50 [0] : vector<16x128xf32> to vector<128xf32>
      %140 = vector.shape_cast %139 : vector<128xf32> to vector<1x128xf32>
      %141 = arith.addf %138, %140 : vector<1x128xf32>
      %c0_51 = arith.constant 0 : index
      %c0_52 = arith.constant 0 : index
      %142 = vector.load %arg9[%c0_51, %c0_52] : memref<1x128xf32, #tpu.memory_space<vmem>>, vector<1x128xf32>
      tpu.vector_store %arg9[%c0_51, %c0_52], %141 {strides = array<i32>} : memref<1x128xf32, #tpu.memory_space<vmem>>, vector<1x128xf32>,
      %c0_53 = arith.constant 0 : index
      %c0_54 = arith.constant 0 : index
      %143 = vector.load %arg10[%c0_53, %c0_54] : memref<1x128xf32, #tpu.memory_space<vmem>>, vector<1x128xf32>
      %cst_55 = arith.constant dense<0.000000e+00> : vector<128xf32>
      %144 = vector.multi_reduction <add>, %137, %cst_55 [0] : vector<16x128xf32> to vector<128xf32>
      %145 = vector.shape_cast %144 : vector<128xf32> to vector<1x128xf32>
      %146 = arith.addf %143, %145 : vector<1x128xf32>
      %c0_56 = arith.constant 0 : index
      %c0_57 = arith.constant 0 : index
      %147 = vector.load %arg10[%c0_56, %c0_57] : memref<1x128xf32, #tpu.memory_space<vmem>>, vector<1x128xf32>
      tpu.vector_store %arg10[%c0_56, %c0_57], %146 {strides = array<i32>} : memref<1x128xf32, #tpu.memory_space<vmem>>, vector<1x128xf32>,
    } else {
    }
    %c1_i32 = arith.constant 1 : i32
    %3 = arith.cmpi eq, %arg1, %c1_i32 : i32
    %4 = arith.extui %3 : i1 to i32
    %c0_i32_1 = arith.constant 0 : i32
    %5 = arith.cmpi ne, %4, %c0_i32_1 : i32
    scf.if %5 {
      %c0_i32_2 = arith.constant 0 : i32
      %6 = arith.cmpi eq, %arg2, %c0_i32_2 : i32
      %7 = arith.extui %6 : i1 to i32
      %c0_i32_3 = arith.constant 0 : i32
      %8 = arith.cmpi ne, %7, %c0_i32_3 : i32
      scf.if %8 {
        %c0_14 = arith.constant 0 : index
        %c0_15 = arith.constant 0 : index
        %22 = vector.load %arg9[%c0_14, %c0_15] : memref<1x128xf32, #tpu.memory_space<vmem>>, vector<1x128xf32>
        %cst_16 = arith.constant 0.001953125 : f32
        %23 = vector.broadcast %cst_16 : f32 to vector<1x128xf32>
        %24 = arith.mulf %22, %23 : vector<1x128xf32>
        %c0_17 = arith.constant 0 : index
        %c0_18 = arith.constant 0 : index
        %25 = vector.load %arg10[%c0_17, %c0_18] : memref<1x128xf32, #tpu.memory_space<vmem>>, vector<1x128xf32>
        %cst_19 = arith.constant 0.001953125 : f32
        %26 = vector.broadcast %cst_19 : f32 to vector<1x128xf32>
        %27 = arith.mulf %25, %26 : vector<1x128xf32>
        %28 = arith.mulf %24, %24 : vector<1x128xf32>
        %29 = arith.subf %27, %28 : vector<1x128xf32>
        %cst_20 = arith.constant 0.000000e+00 : f32
        %30 = vector.broadcast %cst_20 : f32 to vector<1x128xf32>
        %31 = arith.maximumf %29, %30 : vector<1x128xf32>
        %cst_21 = arith.constant 9.99999974E-6 : f32
        %32 = vector.broadcast %cst_21 : f32 to vector<1x128xf32>
        %33 = arith.addf %31, %32 : vector<1x128xf32>
        %34 = math.rsqrt %33 : vector<1x128xf32>
        %c0_22 = arith.constant 0 : index
        %c0_23 = arith.constant 0 : index
        %35 = vector.load %arg5[%c0_22, %c0_23] : memref<1x128xf32, #tpu.memory_space<vmem>>, vector<1x128xf32>
        %36 = arith.mulf %35, %34 : vector<1x128xf32>
        %c0_24 = arith.constant 0 : index
        %c0_25 = arith.constant 0 : index
        %37 = vector.load %arg11[%c0_24, %c0_25] : memref<1x128xf32, #tpu.memory_space<vmem>>, vector<1x128xf32>
        tpu.vector_store %arg11[%c0_24, %c0_25], %36 {strides = array<i32>} : memref<1x128xf32, #tpu.memory_space<vmem>>, vector<1x128xf32>,
        %c0_26 = arith.constant 0 : index
        %c0_27 = arith.constant 0 : index
        %38 = vector.load %arg6[%c0_26, %c0_27] : memref<1x128xf32, #tpu.memory_space<vmem>>, vector<1x128xf32>
        %c0_28 = arith.constant 0 : index
        %c0_29 = arith.constant 0 : index
        %39 = vector.load %arg5[%c0_28, %c0_29] : memref<1x128xf32, #tpu.memory_space<vmem>>, vector<1x128xf32>
        %40 = arith.mulf %39, %34 : vector<1x128xf32>
        %41 = arith.mulf %40, %24 : vector<1x128xf32>
        %42 = arith.subf %38, %41 : vector<1x128xf32>
        %c0_30 = arith.constant 0 : index
        %c0_31 = arith.constant 0 : index
        %43 = vector.load %arg12[%c0_30, %c0_31] : memref<1x128xf32, #tpu.memory_space<vmem>>, vector<1x128xf32>
        tpu.vector_store %arg12[%c0_30, %c0_31], %42 {strides = array<i32>} : memref<1x128xf32, #tpu.memory_space<vmem>>, vector<1x128xf32>,
      } else {
      }
      %c0 = arith.constant 0 : index
      %c0_4 = arith.constant 0 : index
      %9 = vector.load %arg11[%c0, %c0_4] : memref<1x128xf32, #tpu.memory_space<vmem>>, vector<1x128xf32>
      %10 = vector.shape_cast %9 : vector<1x128xf32> to vector<1x1x1x128xf32>
      %c0_5 = arith.constant 0 : index
      %c0_6 = arith.constant 0 : index
      %11 = vector.load %arg12[%c0_5, %c0_6] : memref<1x128xf32, #tpu.memory_space<vmem>>, vector<1x128xf32>
      %12 = vector.shape_cast %11 : vector<1x128xf32> to vector<1x1x1x128xf32>
      %13 = arith.index_cast %arg2 : i32 to index
      %c0_7 = arith.constant 0 : index
      %c0_8 = arith.constant 0 : index
      %c0_9 = arith.constant 0 : index
      %14 = vector.load %arg8[%13, %c0_7, %c0_8, %c0_9] : memref<2x16x16x128xf32, #tpu.memory_space<vmem>>, vector<1x16x16x128xf32>
      %15 = vector.broadcast %10 : vector<1x1x1x128xf32> to vector<1x16x16x128xf32>
      %16 = arith.mulf %14, %15 : vector<1x16x16x128xf32>
      %17 = vector.broadcast %12 : vector<1x1x1x128xf32> to vector<1x16x16x128xf32>
      %18 = arith.addf %16, %17 : vector<1x16x16x128xf32>
      %cst = arith.constant 0.000000e+00 : f32
      %19 = vector.broadcast %cst : f32 to vector<1x16x16x128xf32>
      %20 = arith.maximumf %18, %19 : vector<1x16x16x128xf32>
      %c0_10 = arith.constant 0 : index
      %c0_11 = arith.constant 0 : index
      %c0_12 = arith.constant 0 : index
      %c0_13 = arith.constant 0 : index
      %21 = vector.load %arg7[%c0_10, %c0_11, %c0_12, %c0_13] : memref<1x16x16x128xf32, #tpu.memory_space<vmem>>, vector<1x16x16x128xf32>
      tpu.vector_store %arg7[%c0_10, %c0_11, %c0_12, %c0_13], %20 {strides = array<i32>} : memref<1x16x16x128xf32, #tpu.memory_space<vmem>>, vector<1x16x16x128xf32>,
    } else {
    }
    return
  }
  func.func @transform_0(%arg0: i32, %arg1: i32, %arg2: i32) -> (i32, i32, i32, i32) {
    %c1_i32 = arith.constant 1 : i32
    %0 = arith.subi %c1_i32, %arg1 : i32
    %1 = arith.muli %arg2, %0 : i32
    %c1_i32_0 = arith.constant 1 : i32
    %2 = arith.muli %c1_i32_0, %arg1 : i32
    %3 = arith.addi %1, %2 : i32
    %c0_i32 = arith.constant 0 : i32
    %c0_i32_1 = arith.constant 0 : i32
    %c0_i32_2 = arith.constant 0 : i32
    return %3, %c0_i32, %c0_i32_1, %arg0 : i32, i32, i32, i32
  }
  func.func @transform_1(%arg0: i32, %arg1: i32, %arg2: i32) -> (i32, i32, i32) {
    %c0_i32 = arith.constant 0 : i32
    %c0_i32_0 = arith.constant 0 : i32
    %c0_i32_1 = arith.constant 0 : i32
    return %c0_i32, %c0_i32_0, %arg0 : i32, i32, i32
  }
  func.func @transform_2(%arg0: i32, %arg1: i32, %arg2: i32) -> (i32, i32) {
    %c0_i32 = arith.constant 0 : i32
    %c0_i32_0 = arith.constant 0 : i32
    return %c0_i32, %arg0 : i32, i32
  }
  func.func @transform_3(%arg0: i32, %arg1: i32, %arg2: i32) -> (i32, i32) {
    %c0_i32 = arith.constant 0 : i32
    %c0_i32_0 = arith.constant 0 : i32
    return %c0_i32, %arg0 : i32, i32
  }
  func.func @transform_4(%arg0: i32, %arg1: i32, %arg2: i32) -> (i32, i32, i32, i32) {
    %0 = arith.muli %arg2, %arg1 : i32
    %c0_i32 = arith.constant 0 : i32
    %c0_i32_0 = arith.constant 0 : i32
    %c0_i32_1 = arith.constant 0 : i32
    return %0, %c0_i32, %c0_i32_0, %arg0 : i32, i32, i32, i32
  }
}

</mosaic_0001>

<bundles_post_ra>
// kernel: tpu_custom_call.1
= control target key start
LH: loop header
LB: loop body
LE: loop exit
PB: predicated region body
PF: predicated region fallthrough
CT: control target
= control target key end

     0   :  { %9 = vsyncpa [#allocation8], 0  ;;  %s4763_s0 = inlined_call_operand.vmem [shape: f32[2,18,18,128], index: 0, kind: input, shape index: {}]   ;;  %s4764_s1 = inlined_call_operand.vmem [shape: f32[3,3,128], index: 1, kind: input, shape index: {}]   ;;  %s4765_s2 = inlined_call_operand.vmem [shape: f32[1,128], index: 2, kind: input, shape index: {}]   ;;  %s4766_s3 = inlined_call_operand.vmem [shape: f32[1,128], index: 3, kind: input, shape index: {}]   ;;  %s4767_s4 = inlined_call_operand.hbm [shape: f32[2,16,16,128], index: 4, kind: output, shape index: {}]  }
   0x1   :  { %11 = vsyncpa [#allocation8 + $0x1], 0  ;;  %s2855_s15 = smov 0   ;;  %s2857_s16 = smov 0  }
   0x2   :  { %s2859_s17 = smov 0   ;;  %s2861_s18 = smov 0  }
   0x3   :  { %s2863_s19 = smov 0   ;;  %s2865_s20 = smov 0  }
   0x4   :  { %s2867_s21 = smov 0   ;;  %s2869_s22 = smov 0  }
   0x5 LB: > { %s2549_s23 = sadd.s32 4294967295, %s2824_s22   ;;  %s2550_s24 = sadd.s32 4294967294, %s2824_s22   ;;  %s2824_s22 = sphi %s2869_s22, %s17_s22   ;;  %s2820_s21 = sphi %s2867_s21, %s4776_s21   ;;  %s2816_s20 = sphi %s2865_s20, %s4775_s20   ;;  %s2812_s19 = sphi %s2863_s19, %s4774_s19   ;;  %s2808_s18 = sphi %s2861_s18, %s4773_s18   ;;  %s2804_s17 = sphi %s2859_s17, %s4772_s17   ;;  %s2800_s16 = sphi %s2857_s16, %s4771_s16   ;;  %s2796_s15 = sphi %s2855_s15, %s4770_s15  }
   0x6   : > { %s29_s25 = sadd.s32 1, %s2816_s20  ;;  %s32_s26 = sadd.s32 1, %s2820_s21 }
   0x7   : > { %p30_p0 = scmp.ge.s32.totalorder %s29_s25, 2  ;;  %s152_s27 = smul.u32 %s2816_s20, %s2820_s21 }
   0x8   : > { %p169_p1 = scmp.ne.s32.totalorder %s2804_s17, %s2800_s16  ;;  %p170_p2 = scmp.eq.s32.totalorder %s2549_s23, 3 }
   0x9   : > { %s4778_s25 = smov (%p30_p0, %s29_s25), 0  ;;  %s4780_s26 = smov (!%p30_p0, %s32_s26), %s2820_s21 }
   0xa   : > { %p175_p3 = scmp.ne.s32.totalorder %s2800_s16, %s2796_s15  ;;  %p34_p4 = scmp.ge.s32.totalorder %s4780_s26, 2 }
   0xb   : > { %p176_p5 = scmp.eq.s32.totalorder %s2550_s24, 3  ;;  %p2908_p6 = por %p170_p2, %p169_p1 }
   0xc   : > { %p2556_p7 = scmp.ge.s32.totalorder %s2824_s22, 1  ;;  %s4782_s26 = smov (%p34_p4, %s4780_s26), 0 }
   0xd   : > { %p2915_p8 = por %p176_p5, %p175_p3  ;;  %p230_p9 = scmp.lt.s32.totalorder %s2824_s22, 5 }
   0xe   : > { %s153_s30 = smul.u32 %s4782_s26, %s4778_s25  ;;  %s159_s6 = sadd.s32 1, %s2804_s17 }
   0xf   : > { %p231_p10 = pnand %p2556_p7, %p230_p9 }
  0x10   : > { %s154_s5 = ssub.s32 %s152_s27, %s153_s30  ;;  %s269_s8 = sand.u32 (!%p231_p10), 1, %s2800_s16  }
  0x11   : > { %p157_p11 = scmp.eq.s32.totalorder %s154_s5, 0  ;;  %234 = sbr.rel (%p231_p10) target bundleno = 468 (0x1d4), region = 36 }
  0x12   : > { %s272_s9 = ssub.s32 (!%p231_p10), 1, %s2812_s19  ;;  %s2557_s10 = sshll.u32 (!%p231_p10), %s269_s8, 8 }
  0x13   : > { %s2924_s7 = scalar_select %p157_p11, %s2804_s17, %s159_s6  }
  0x14   : > { %s273_s11 = smul.u32 (!%p231_p10), %s2808_s18, %s272_s9  ;;  %s2937_s27 = scalar_lea.vmem (!%p231_p10), [#allocation7], %s2557_s10 }
  0x15   : > { %p2559_p13 = scmp.ne.s32.totalorder (!%p231_p10), %s2812_s19, 0 }
  0x16   : > { %s274_s12 = sadd.s32 (!%p231_p10), %s2812_s19, %s273_s11 }
  0x17   : > { %p275_p12 = scmp.lt.s32.totalorder (!%p231_p10), %s274_s12, 1 }
  0x18   : > { %300 = sbr.rel (%p2559_p13) target bundleno = 371 (0x173), region = 40  ;;  %p2560_p0 = scmp.ne.s32.totalorder (!%p2559_p13), %s2808_s18, 0 }
  0x19   : > { %s4784_s12 = smov (!%p275_p12, %s274_s12), 1 }
  0x1a   : > { %s2635_s13 = smul.u32 432, %s4784_s12 }
  0x1c   : > { %s2935_s24 = scalar_lea.vmem %s4763_s0, %s2635_s13 }
  0x1f   : > { %304 = sbr.rel (%p2560_p0) target bundleno = 38 (0x26), region = 44  ;;  %v2826_v0 = vmov (!%p2560_p0), 0.0  }
  0x20   : > { %305 = vst [vmem:[#allocation3] sm:$0x1] (!%p2560_p0), %v2826_v0  ;;  %306 = vst [vmem:[#allocation4] sm:$0x1] (!%p2560_p0), %v2826_v0 }
  0x26 PF: > { %v2944_v1 = vld [vmem:[%s4764_s1 + $0x1] ss:$0 sm:$0xff]  ;;  %v2949_v2 = vld [vmem:[%s4764_s1 + $0x2] ss:$0 sm:$0xff]  ;;  %v2954_v3 = vld [vmem:[%s4764_s1] ss:$0 sm:$0xff] }
  0x27   : > { %v2959_v4 = vld [vmem:[%s4764_s1 + $0x5] ss:$0 sm:$0xff]  ;;  %v2964_v5 = vld [vmem:[%s4764_s1 + $0x6] ss:$0 sm:$0xff]  ;;  %v319_v7 = vld [vmem:[%s2935_s24 + $0x8] sm:$0xff]  ;;  %vm436_vm0 = vcmask 1046528  }
  0x28   : > { %v318_v6 = vld [vmem:[%s2935_s24] sm:$0xff]  ;;  %v2969_v8 = vld [vmem:[%s2935_s24 + $0x18] sm:$0xff]  ;;  %v389_v11 = vmul.f32 %v2944_v1, %v319_v7  ;;  %vm561_vm1 = vcmask 1045504   ;;  %v2985_v14 = vld [vmem:[%s4764_s1 + $0x9] ss:$0 sm:$0xff]  ;;  %v514_v16 = vmul.f32 %v2949_v2, %v319_v7  ;;  %v353_v46 = vmul.f32 %v2954_v3, %v319_v7  ;;  %s2576_s14 = sshll.u32 %s2808_s18, 8 }
  0x29   : > { %v2972_v9 = vld [vmem:[%s2935_s24 + $0x20] sm:$0xff]  ;;  %v388_v10 = vmul.f32 %v2944_v1, %v318_v6  ;;  %v513_v12 = vmul.f32 %v2949_v2, %v318_v6  ;;  %v352_v15 = vmul.f32 %v2954_v3, %v318_v6  ;;  %v674_v17 = vmul.f32 %v2959_v4, %v2969_v8  ;;  %v2996_v19 = vld [vmem:[%s4764_s1 + $0x8] ss:$0 sm:$0xff]  ;;  %v3003_v24 = vld [vmem:[%s4764_s1 + $0xa] ss:$0 sm:$0xff]  ;;  %s3090_s23 = scalar_lea.vmem [#allocation2], %s2576_s14 }
  0x2a   : > { %v2980_v13 = vld [vmem:[%s4764_s1 + $0x4] ss:$0 sm:$0xff]  ;;  %v675_v18 = vmul.f32 %v2959_v4, %v2972_v9  ;;  %v438_v21 = vrot.slane %v389_v11, 1  ;;  %v798_v23 = vmul.f32 %v2964_v5, %v2969_v8  ;;  %v3006_v25 = vld [vmem:[%s2935_s24 + $0x30] sm:$0xff]  ;;  %v563_v26 = vrot.slane %v514_v16, 2  ;;  %v3017_v35 = vld [vmem:[%s2935_s24 + $0x38] sm:$0xff] }
  0x2b   : > { %v437_v20 = vrot.slane %v388_v10, 1  ;;  %v562_v22 = vrot.slane %v513_v12, 2  ;;  %v722_v27 = vrot.slane %v674_v17, 1  ;;  %v799_v29 = vmul.f32 %v2964_v5, %v2972_v9  ;;  %v320_v34 = vld [vmem:[%s2935_s24 + $0x10] sm:$0x3] }
  0x2c   : > { %v723_v28 = vrot.slane %v675_v18, 1  ;;  %v638_v31 = vmul.f32 %v2980_v13, %v2969_v8  ;;  %v846_v32 = vrot.slane %v798_v23, 2  ;;  %v958_v33 = vmul.f32 %v2985_v14, %v3006_v25  ;;  %v3035_v51 = vld [vmem:[%s2935_s24 + $0x28] sm:$0x3]  ;;  %v3048_v63 = vld [vmem:[%s2935_s24 + $0x40] sm:$0x3] }
  0x2d   : > { %v439_v30 = vsel %vm436_vm0, %v437_v20, %v438_v21  ;;  %v564_v37 = vsel %vm561_vm1, %v562_v22, %v563_v26  ;;  %v847_v38 = vrot.slane %v799_v29, 2  ;;  %v922_v39 = vmul.f32 %v2996_v19, %v3006_v25 }
  0x2e   : > { %v493_v36 = vadd.f32 %v439_v30, %v352_v15  ;;  %v959_v40 = vmul.f32 %v2985_v14, %v3017_v35  ;;  %v1006_v41 = vrot.slane %v958_v33, 1  ;;  %v1082_v42 = vmul.f32 %v3003_v24, %v3006_v25 }
  0x2f   : > { %v3028_v43 = vmul.f32 %v3003_v24, %v3017_v35  ;;  %v724_v45 = vsel %vm436_vm0, %v722_v27, %v723_v28  ;;  %v390_v47 = vmul.f32 %v2944_v1, %v320_v34  ;;  %v515_v52 = vmul.f32 %v2949_v2, %v320_v34 }
  0x30   : > { %v618_v44 = vadd.f32 %v564_v37, %v493_v36  ;;  %v1007_v48 = vrot.slane %v959_v40, 1  ;;  %v1130_v49 = vrot.slane %v1082_v42, 2  ;;  %v848_v54 = vsel %vm561_vm1, %v846_v32, %v847_v38 }
  0x31   : > { %v1131_v50 = vrot.slane %v3028_v43, 2  ;;  %v440_v55 = vrot.slane %v390_v47, 1  ;;  %v676_v56 = vmul.f32 %v2959_v4, %v3035_v51  ;;  %v565_v58 = vrot.slane %v515_v52, 2 }
  0x32   : > { %v654_v53 = vadd.f32 %v638_v31, %v618_v44  ;;  %v1008_v57 = vsel %vm436_vm0, %v1006_v41, %v1007_v48  ;;  %v639_v59 = vmul.f32 %v2980_v13, %v2972_v9  ;;  %v800_v60 = vmul.f32 %v2964_v5, %v3035_v51 }
  0x33   : > { %v1132_v62 = vsel %vm561_vm1, %v1130_v49, %v1131_v50  ;;  %v441_v0 = vsel %vm436_vm0, %v438_v21, %v440_v55  ;;  %v725_v6 = vrot.slane %v676_v56, 1  ;;  %v566_v10 = vsel %vm561_vm1, %v563_v26, %v565_v58 }
  0x34   : > { %v778_v61 = vadd.f32 %v724_v45, %v654_v53  ;;  %v494_v7 = vadd.f32 %v441_v0, %v353_v46  ;;  %v849_v11 = vrot.slane %v800_v60, 2  ;;  %v960_v12 = vmul.f32 %v2985_v14, %v3048_v63  ;;  %v3096_v53 = vld [vmem:[%s2935_s24 + $0x48] sm:$0xff] }
  0x35   : > { %v726_v16 = vsel %vm436_vm0, %v723_v28, %v725_v6  ;;  %v923_v17 = vmul.f32 %v2996_v19, %v3017_v35  ;;  %v1084_v18 = vmul.f32 %v3003_v24, %v3048_v63  ;;  %v354_v21 = vmul.f32 %v2954_v3, %v2969_v8 }
  0x36   : > { %v902_v15 = vadd.f32 %v848_v54, %v778_v61  ;;  %v619_v20 = vadd.f32 %v566_v10, %v494_v7  ;;  %v1009_v22 = vrot.slane %v960_v12, 1  ;;  %v391_v23 = vmul.f32 %v2944_v1, %v2969_v8 }
  0x37   : > { %v850_v27 = vsel %vm561_vm1, %v847_v38, %v849_v11  ;;  %v3067_v28 = vmul.f32 %v2944_v1, %v2972_v9  ;;  %v516_v29 = vmul.f32 %v2949_v2, %v2969_v8  ;;  %v1133_v31 = vrot.slane %v1084_v18, 2 }
  0x38   : > { %v938_v26 = vadd.f32 %v922_v39, %v902_v15  ;;  %v655_v30 = vadd.f32 %v639_v59, %v619_v20  ;;  %v442_v32 = vrot.slane %v391_v23, 1  ;;  %v3073_v33 = vmul.f32 %v2949_v2, %v2972_v9  ;;  %v3105_v59 = vld [vmem:[%s2935_s24 + $0x50] sm:$0xff] }
  0x39   : > { %v1010_v36 = vsel %vm436_vm0, %v1007_v48, %v1009_v22  ;;  %v443_v37 = vrot.slane %v3067_v28, 1  ;;  %v567_v38 = vrot.slane %v516_v29, 2  ;;  %v640_v8 = vmul.f32 %v2980_v13, %v3006_v25 }
  0x3a   : > { %v1062_v34 = vadd.f32 %v1008_v57, %v938_v26  ;;  %v779_v39 = vadd.f32 %v726_v16, %v655_v30  ;;  %v568_v40 = vrot.slane %v3073_v33, 2  ;;  %v677_v41 = vmul.f32 %v2959_v4, %v3006_v25 }
  0x3b   : > { %v444_v43 = vsel %vm436_vm0, %v442_v32, %v443_v37  ;;  %v678_v44 = vmul.f32 %v2959_v4, %v3017_v35  ;;  %v801_v45 = vmul.f32 %v2964_v5, %v3006_v25  ;;  %v1134_v52 = vsel %vm561_vm1, %v1131_v50, %v1133_v31 }
  0x3c   : > { %v3082_v42 = vadd.f32 %v1132_v62, %v1062_v34  ;;  %v903_v46 = vadd.f32 %v850_v27, %v779_v39  ;;  %v495_v47 = vadd.f32 %v444_v43, %v354_v21  ;;  %v569_v48 = vsel %vm561_vm1, %v567_v38, %v568_v40 }
  0x3d   : > { %v727_v49 = vrot.slane %v677_v41, 1  ;;  %v728_v54 = vrot.slane %v678_v44, 1  ;;  %v802_v55 = vmul.f32 %v2964_v5, %v3017_v35  ;;  %v851_v56 = vrot.slane %v801_v45, 2 }
  0x3e   : > { %1204 = vst [vmem:[%s3090_s23] sm:$0xff] %v3082_v42  ;;  %v3102_v57 = vmul.f32 %v3082_v42, %v3082_v42  ;;  %v939_v58 = vadd.f32 %v923_v17, %v903_v46  ;;  %v620_v60 = vadd.f32 %v569_v48, %v495_v47  ;;  %v961_v61 = vmul.f32 %v2985_v14, %v3096_v53 }
  0x3f   : > { %v729_v50 = vsel %vm436_vm0, %v727_v49, %v728_v54  ;;  %v852_v62 = vrot.slane %v802_v55, 2  ;;  %v962_v0 = vmul.f32 %v2985_v14, %v3105_v59  ;;  %v1085_v6 = vmul.f32 %v3003_v24, %v3096_v53 }
  0x40   : > { %v1063_v7 = vadd.f32 %v1010_v36, %v939_v58  ;;  %v656_v10 = vadd.f32 %v640_v8, %v620_v60  ;;  %v1011_v11 = vrot.slane %v961_v61, 1  ;;  %v3116_v12 = vmul.f32 %v3003_v24, %v3105_v59 }
  0x41   : > { %v853_v15 = vsel %vm561_vm1, %v851_v56, %v852_v62  ;;  %v924_v16 = vmul.f32 %v2996_v19, %v3096_v53  ;;  %v1012_v17 = vrot.slane %v962_v0, 1  ;;  %v1135_v18 = vrot.slane %v1085_v6, 2 }
  0x42   : > { %v3121_v20 = vadd.f32 %v1134_v52, %v1063_v7  ;;  %v780_v22 = vadd.f32 %v729_v50, %v656_v10  ;;  %v1136_v21 = vrot.slane %v3116_v12, 2  ;;  %v393_v23 = vmul.f32 %v2944_v1, %v3035_v51 }
  0x43   : > { %v1013_v26 = vsel %vm436_vm0, %v1011_v11, %v1012_v17  ;;  %v355_v27 = vmul.f32 %v2954_v3, %v2972_v9  ;;  %v518_v28 = vmul.f32 %v2949_v2, %v3035_v51  ;;  %v679_v29 = vmul.f32 %v2959_v4, %v3048_v63  ;;  %v3143_v9 = vld [vmem:[%s2935_s24 + $0x58] sm:$0x3] }
  0x44   : > { %1205 = vst [vmem:[%s3090_s23 + $0x8] sm:$0xff] %v3121_v20  ;;  %v3137_v30 = vmul.f32 %v3121_v20, %v3121_v20  ;;  %v904_v31 = vadd.f32 %v853_v15, %v780_v22  ;;  %v445_v32 = vrot.slane %v393_v23, 1  ;;  %v641_v33 = vmul.f32 %v2980_v13, %v3017_v35 }
  0x45   : > { %v1137_v34 = vsel %vm561_vm1, %v1135_v18, %v1136_v21  ;;  %v570_v36 = vrot.slane %v518_v28, 2  ;;  %v730_v51 = vrot.slane %v679_v29, 1  ;;  %v803_v38 = vmul.f32 %v2964_v5, %v3048_v63 }
  0x46   : > { %v940_v39 = vadd.f32 %v924_v16, %v904_v31  ;;  %v446_v8 = vsel %vm436_vm0, %v443_v37, %v445_v32  ;;  %v963_v41 = vmul.f32 %v2985_v14, %v3143_v9  ;;  %v1087_v43 = vmul.f32 %v3003_v24, %v3143_v9 }
  0x47   : > { %v496_v44 = vadd.f32 %v446_v8, %v355_v27  ;;  %v571_v45 = vsel %vm561_vm1, %v568_v40, %v570_v36  ;;  %v854_v46 = vrot.slane %v803_v38, 2  ;;  %v925_v47 = vmul.f32 %v2996_v19, %v3105_v59 }
  0x48   : > { %v1064_v48 = vadd.f32 %v1013_v26, %v940_v39  ;;  %v731_v49 = vsel %vm436_vm0, %v728_v54, %v730_v51  ;;  %v1014_v52 = vrot.slane %v963_v41, 1  ;;  %v1138_v55 = vrot.slane %v1087_v43, 2 }
  0x49   : > { %v621_v37 = vadd.f32 %v571_v45, %v496_v44  ;;  %v356_v56 = vmul.f32 %v2954_v3, %v3006_v25  ;;  %v394_v58 = vmul.f32 %v2944_v1, %v3006_v25  ;;  %v3162_v40 = vmul.f32 %v2944_v1, %v3017_v35 }
  0x4a   : > { %v1188_v60 = vadd.f32 %v1137_v34, %v1064_v48  ;;  %v855_v61 = vsel %vm561_vm1, %v852_v62, %v854_v46  ;;  %v1015_v50 = vsel %vm436_vm0, %v1012_v17, %v1014_v52  ;;  %v519_v54 = vmul.f32 %v2949_v2, %v3006_v25 }
  0x4b   : > { %v657_v0 = vadd.f32 %v641_v33, %v621_v37  ;;  %v447_v6 = vrot.slane %v394_v58, 1  ;;  %v448_v7 = vrot.slane %v3162_v40, 1  ;;  %v520_v10 = vmul.f32 %v2949_v2, %v3017_v35  ;;  %v3192_v33 = vld [vmem:[%s2935_s24 + $0x60] sm:$0xff] }
  0x4c   : > { %1206 = vst [vmem:[%s3090_s23 + $0x10] sm:$0xff] %v1188_v60  ;;  %v3173_v11 = vadd.f32 %v1188_v60, %v3082_v42  ;;  %v1238_v12 = vmul.f32 %v1188_v60, %v1188_v60  ;;  %v572_v15 = vrot.slane %v519_v54, 2  ;;  %v642_v62 = vmul.f32 %v2980_v13, %v3096_v53 }
  0x4d   : > { %v781_v16 = vadd.f32 %v731_v49, %v657_v0  ;;  %v449_v25 = vsel %vm436_vm0, %v447_v6, %v448_v7  ;;  %v573_v17 = vrot.slane %v520_v10, 2  ;;  %v680_v18 = vmul.f32 %v2959_v4, %v3096_v53 }
  0x4e   : > { %v3181_v22 = vadd.f32 %v1238_v12, %v3102_v57  ;;  %v497_v23 = vadd.f32 %v449_v25, %v356_v56  ;;  %v681_v42 = vmul.f32 %v2959_v4, %v3105_v59  ;;  %v804_v26 = vmul.f32 %v2964_v5, %v3096_v53  ;;  %v3195_v57 = vld [vmem:[%s2935_s24 + $0x68] sm:$0xff] }
  0x4f   : > { %v905_v27 = vadd.f32 %v855_v61, %v781_v16  ;;  %v574_v28 = vsel %vm561_vm1, %v572_v15, %v573_v17  ;;  %v732_v29 = vrot.slane %v680_v18, 1  ;;  %v805_v31 = vmul.f32 %v2964_v5, %v3105_v59  ;;  %v3224_v16 = vld [vmem:[%s2935_s24 + $0x70] sm:$0x3] }
  0x50   : > { %v1139_v32 = vsel %vm561_vm1, %v1136_v21, %v1138_v55  ;;  %v622_v34 = vadd.f32 %v574_v28, %v497_v23  ;;  %v733_v36 = vrot.slane %v681_v42, 1  ;;  %v856_v51 = vrot.slane %v804_v26, 2 }
  0x51   : > { %v941_v38 = vadd.f32 %v925_v47, %v905_v27  ;;  %v857_v39 = vrot.slane %v805_v31, 2  ;;  %v964_v8 = vmul.f32 %v2985_v14, %v3192_v33  ;;  %v965_v41 = vmul.f32 %v2985_v14, %v3195_v57 }
  0x52   : > { %v658_v43 = vadd.f32 %v642_v62, %v622_v34  ;;  %v734_v44 = vsel %vm436_vm0, %v732_v29, %v733_v36  ;;  %v1088_v21 = vmul.f32 %v3003_v24, %v3192_v33  ;;  %v1089_v45 = vmul.f32 %v3003_v24, %v3195_v57 }
  0x53   : > { %v1065_v46 = vadd.f32 %v1015_v50, %v941_v38  ;;  %v858_v47 = vsel %vm561_vm1, %v856_v51, %v857_v39  ;;  %v1016_v48 = vrot.slane %v964_v8, 1  ;;  %v1017_v49 = vrot.slane %v965_v41, 1 }
  0x54   : > { %v782_v52 = vadd.f32 %v734_v44, %v658_v43  ;;  %v926_v55 = vmul.f32 %v2996_v19, %v3192_v33  ;;  %v1140_v37 = vrot.slane %v1088_v21, 2  ;;  %v1141_v56 = vrot.slane %v1089_v45, 2 }
  0x55   : > { %v1189_v58 = vadd.f32 %v1139_v32, %v1065_v46  ;;  %v357_v40 = vmul.f32 %v2954_v3, %v3017_v35  ;;  %v396_v60 = vmul.f32 %v2944_v1, %v3048_v63  ;;  %v521_v61 = vmul.f32 %v2949_v2, %v3048_v63 }
  0x56   : > { %v906_v50 = vadd.f32 %v858_v47, %v782_v52  ;;  %v1018_v54 = vsel %vm436_vm0, %v1016_v48, %v1017_v49  ;;  %v1142_v0 = vsel %vm561_vm1, %v1140_v37, %v1141_v56  ;;  %v682_v6 = vmul.f32 %v2959_v4, %v3143_v9 }
  0x57   : > { %1207 = vst [vmem:[%s3090_s23 + $0x18] sm:$0xff] %v1189_v58  ;;  %v3221_v10 = vadd.f32 %v1189_v58, %v3121_v20  ;;  %v1239_v12 = vmul.f32 %v1189_v58, %v1189_v58  ;;  %v450_v35 = vrot.slane %v396_v60, 1  ;;  %v575_v15 = vrot.slane %v521_v61, 2 }
  0x58   : > { %v942_v62 = vadd.f32 %v926_v55, %v906_v50  ;;  %v643_v63 = vmul.f32 %v2980_v13, %v3105_v59  ;;  %v735_v25 = vrot.slane %v682_v6, 1  ;;  %v806_v18 = vmul.f32 %v2964_v5, %v3143_v9  ;;  %v3273_v50 = vld [vmem:[%s2935_s24 + $0x78] sm:$0xff]  ;;  %v3280_v6 = vld [vmem:[%s2935_s24 + $0x80] sm:$0xff] }
  0x59   : > { %v3231_v23 = vadd.f32 %v1239_v12, %v3137_v30  ;;  %v451_v42 = vsel %vm436_vm0, %v448_v7, %v450_v35  ;;  %v576_v20 = vsel %vm561_vm1, %v573_v17, %v575_v15  ;;  %v966_v26 = vmul.f32 %v2985_v14, %v3224_v16 }
  0x5a   : > { %v1066_v27 = vadd.f32 %v1018_v54, %v942_v62  ;;  %v498_v28 = vadd.f32 %v451_v42, %v357_v40  ;;  %v859_v29 = vrot.slane %v806_v18, 2  ;;  %v927_v31 = vmul.f32 %v2996_v19, %v3195_v57 }
  0x5b   : > { %v736_v32 = vsel %vm436_vm0, %v733_v36, %v735_v25  ;;  %v1019_v34 = vrot.slane %v966_v26, 1  ;;  %v1090_v30 = vmul.f32 %v3003_v24, %v3224_v16  ;;  %v397_v7 = vmul.f32 %v2944_v1, %v3096_v53 }
  0x5c   : > { %v1190_v17 = vadd.f32 %v1142_v0, %v1066_v27  ;;  %v623_v51 = vadd.f32 %v576_v20, %v498_v28  ;;  %v358_v38 = vmul.f32 %v2954_v3, %v3096_v53  ;;  %v3248_v8 = vmul.f32 %v2944_v1, %v3105_v59 }
  0x5d   : > { %v860_v41 = vsel %vm561_vm1, %v857_v39, %v859_v29  ;;  %v1143_v43 = vrot.slane %v1090_v30, 2  ;;  %v452_v36 = vrot.slane %v397_v7, 1  ;;  %v522_v44 = vmul.f32 %v2949_v2, %v3096_v53 }
  0x5e   : > { %1208 = vst [vmem:[%s3090_s23 + $0x20] sm:$0xff] %v1190_v17  ;;  %v3255_v21 = vadd.f32 %v3173_v11, %v1190_v17  ;;  %v1240_v45 = vmul.f32 %v1190_v17, %v1190_v17  ;;  %v659_v46 = vadd.f32 %v643_v63, %v623_v51  ;;  %v453_v47 = vrot.slane %v3248_v8, 1 }
  0x5f   : > { %v1020_v48 = vsel %vm436_vm0, %v1017_v49, %v1019_v34  ;;  %v1144_v52 = vsel %vm561_vm1, %v1141_v56, %v1143_v43  ;;  %v523_v39 = vmul.f32 %v2949_v2, %v3105_v59  ;;  %v577_v55 = vrot.slane %v522_v44, 2 }
  0x60   : > { %v3263_v53 = vadd.f32 %v3181_v22, %v1240_v45  ;;  %v783_v37 = vadd.f32 %v736_v32, %v659_v46  ;;  %v454_v11 = vsel %vm436_vm0, %v452_v36, %v453_v47  ;;  %v683_v58 = vmul.f32 %v2959_v4, %v3192_v33 }
  0x61   : > { %v499_v40 = vadd.f32 %v454_v11, %v358_v38  ;;  %v578_v60 = vrot.slane %v523_v39, 2  ;;  %v684_v49 = vmul.f32 %v2959_v4, %v3195_v57  ;;  %v807_v56 = vmul.f32 %v2964_v5, %v3192_v33 }
  0x62   : > { %v907_v61 = vadd.f32 %v860_v41, %v783_v37  ;;  %v644_v22 = vmul.f32 %v2980_v13, %v3192_v33  ;;  %v737_v54 = vrot.slane %v683_v58, 1  ;;  %v808_v0 = vmul.f32 %v2964_v5, %v3195_v57 }
  0x63   : > { %v579_v12 = vsel %vm561_vm1, %v577_v55, %v578_v60  ;;  %v738_v35 = vrot.slane %v684_v49, 1  ;;  %v861_v15 = vrot.slane %v807_v56, 2  ;;  %v967_v62 = vmul.f32 %v2985_v14, %v3273_v50  ;;  %v3323_v49 = vld [vmem:[%s2935_s24 + $0x88] sm:$0x3] }
  0x64   : > { %v943_v63 = vadd.f32 %v927_v31, %v907_v61  ;;  %v624_v25 = vadd.f32 %v579_v12, %v499_v40  ;;  %v862_v18 = vrot.slane %v808_v0, 2  ;;  %v968_v42 = vmul.f32 %v2985_v14, %v3280_v6 }
  0x65   : > { %v739_v20 = vsel %vm436_vm0, %v737_v54, %v738_v35  ;;  %v1021_v26 = vrot.slane %v967_v62, 1  ;;  %v1091_v27 = vmul.f32 %v3003_v24, %v3273_v50  ;;  %v3292_v28 = vmul.f32 %v3003_v24, %v3280_v6 }
  0x66   : > { %v1067_v29 = vadd.f32 %v1020_v48, %v943_v63  ;;  %v660_v32 = vadd.f32 %v644_v22, %v624_v25  ;;  %v928_v31 = vmul.f32 %v2996_v19, %v3273_v50  ;;  %v1022_v34 = vrot.slane %v968_v42, 1 }
  0x67   : > { %v863_v30 = vsel %vm561_vm1, %v861_v15, %v862_v18  ;;  %v1145_v7 = vrot.slane %v1091_v27, 2  ;;  %v1146_v17 = vrot.slane %v3292_v28, 2  ;;  %v399_v51 = vmul.f32 %v2944_v1, %v3143_v9 }
  0x68   : > { %v1191_v38 = vadd.f32 %v1144_v52, %v1067_v29  ;;  %v784_v8 = vadd.f32 %v739_v20, %v660_v32  ;;  %v359_v41 = vmul.f32 %v2954_v3, %v3105_v59  ;;  %v524_v43 = vmul.f32 %v2949_v2, %v3143_v9 }
  0x69   : > { %v1023_v36 = vsel %vm436_vm0, %v1021_v26, %v1022_v34  ;;  %v1147_v44 = vsel %vm561_vm1, %v1145_v7, %v1146_v17  ;;  %v455_v45 = vrot.slane %v399_v51, 1  ;;  %v685_v46 = vmul.f32 %v2959_v4, %v3224_v16 }
  0x6a   : > { %1209 = vst [vmem:[%s3090_s23 + $0x28] sm:$0xff] %v1191_v38  ;;  %v3312_v48 = vadd.f32 %v3221_v10, %v1191_v38  ;;  %v1241_v52 = vmul.f32 %v1191_v38, %v1191_v38  ;;  %v908_v59 = vadd.f32 %v863_v30, %v784_v8  ;;  %v580_v39 = vrot.slane %v524_v43, 2 }
  0x6b   : > { %v456_v9 = vsel %vm436_vm0, %v453_v47, %v455_v45  ;;  %v645_v55 = vmul.f32 %v2980_v13, %v3195_v57  ;;  %v740_v37 = vrot.slane %v685_v46, 1  ;;  %v809_v11 = vmul.f32 %v2964_v5, %v3224_v16 }
  0x6c   : > { %v3320_v58 = vadd.f32 %v3231_v23, %v1241_v52  ;;  %v944_v40 = vadd.f32 %v928_v31, %v908_v59  ;;  %v500_v10 = vadd.f32 %v456_v9, %v359_v41  ;;  %v581_v56 = vsel %vm561_vm1, %v578_v60, %v580_v39  ;;  %v3371_v39 = vld [vmem:[%s2935_s24 + $0x90] sm:$0xff]  ;;  %v3374_v9 = vld [vmem:[%s2935_s24 + $0x98] sm:$0xff] }
  0x6d   : > { %v864_v61 = vrot.slane %v809_v11, 2  ;;  %v929_v47 = vmul.f32 %v2996_v19, %v3280_v6  ;;  %v969_v22 = vmul.f32 %v2985_v14, %v3323_v49  ;;  %v1093_v54 = vmul.f32 %v3003_v24, %v3323_v49 }
  0x6e   : > { %v1068_v0 = vadd.f32 %v1023_v36, %v944_v40  ;;  %v625_v23 = vadd.f32 %v581_v56, %v500_v10  ;;  %v741_v12 = vsel %vm436_vm0, %v738_v35, %v740_v37  ;;  %v400_v15 = vmul.f32 %v2944_v1, %v3192_v33 }
  0x6f   : > { %v865_v60 = vsel %vm561_vm1, %v862_v18, %v864_v61  ;;  %v1024_v62 = vrot.slane %v969_v22, 1  ;;  %v360_v63 = vmul.f32 %v2954_v3, %v3192_v33  ;;  %v3340_v25 = vmul.f32 %v2944_v1, %v3195_v57 }
  0x70   : > { %v1192_v42 = vadd.f32 %v1147_v44, %v1068_v0  ;;  %v661_v20 = vadd.f32 %v645_v55, %v625_v23  ;;  %v457_v26 = vrot.slane %v400_v15, 1  ;;  %v525_v27 = vmul.f32 %v2949_v2, %v3192_v33 }
  0x71   : > { %v1025_v35 = vsel %vm436_vm0, %v1022_v34, %v1024_v62  ;;  %v1148_v29 = vrot.slane %v1093_v54, 2  ;;  %v458_v32 = vrot.slane %v3340_v25, 1  ;;  %v526_v18 = vmul.f32 %v2949_v2, %v3195_v57 }
  0x72   : > { %1210 = vst [vmem:[%s3090_s23 + $0x30] sm:$0xff] %v1192_v42  ;;  %v3350_v31 = vadd.f32 %v3255_v21, %v1192_v42  ;;  %v1242_v30 = vmul.f32 %v1192_v42, %v1192_v42  ;;  %v785_v7 = vadd.f32 %v741_v12, %v661_v20  ;;  %v582_v51 = vrot.slane %v525_v27, 2 }
  0x73   : > { %v459_v38 = vsel %vm436_vm0, %v457_v26, %v458_v32  ;;  %v583_v33 = vrot.slane %v526_v18, 2  ;;  %v646_v34 = vmul.f32 %v2980_v13, %v3273_v50  ;;  %v686_v8 = vmul.f32 %v2959_v4, %v3273_v50 }
  0x74   : > { %v3358_v41 = vadd.f32 %v3263_v53, %v1242_v30  ;;  %v909_v43 = vadd.f32 %v865_v60, %v785_v7  ;;  %v501_v21 = vadd.f32 %v459_v38, %v360_v63  ;;  %v687_v36 = vmul.f32 %v2959_v4, %v3280_v6 }
  0x75   : > { %v584_v44 = vsel %vm561_vm1, %v582_v51, %v583_v33  ;;  %v742_v45 = vrot.slane %v686_v8, 1  ;;  %v810_v46 = vmul.f32 %v2964_v5, %v3273_v50  ;;  %v811_v52 = vmul.f32 %v2964_v5, %v3280_v6 }
  0x76   : > { %v945_v59 = vadd.f32 %v929_v47, %v909_v43  ;;  %v1149_v53 = vsel %vm561_vm1, %v1146_v17, %v1148_v29  ;;  %v626_v55 = vadd.f32 %v584_v44, %v501_v21  ;;  %v743_v37 = vrot.slane %v687_v36, 1 }
  0x77   : > { %v866_v11 = vrot.slane %v810_v46, 2  ;;  %v867_v40 = vrot.slane %v811_v52, 2  ;;  %v970_v10 = vmul.f32 %v2985_v14, %v3371_v39  ;;  %v971_v56 = vmul.f32 %v2985_v14, %v3374_v9 }
  0x78   : > { %v1069_v61 = vadd.f32 %v1025_v35, %v945_v59  ;;  %v662_v47 = vadd.f32 %v646_v34, %v626_v55  ;;  %v744_v28 = vsel %vm436_vm0, %v742_v45, %v743_v37  ;;  %v1094_v17 = vmul.f32 %v3003_v24, %v3371_v39 }
  0x79   : > { %v868_v22 = vsel %vm561_vm1, %v866_v11, %v867_v40  ;;  %v1026_v54 = vrot.slane %v970_v10, 1  ;;  %v1027_v0 = vrot.slane %v971_v56, 1  ;;  %v3386_v23 = vmul.f32 %v3003_v24, %v3374_v9 }
  0x7a   : > { %v1193_v12 = vadd.f32 %v1149_v53, %v1069_v61  ;;  %v786_v15 = vadd.f32 %v744_v28, %v662_v47  ;;  %v930_v60 = vmul.f32 %v2996_v19, %v3371_v39  ;;  %v1150_v62 = vrot.slane %v1094_v17, 2 }
  0x7b   : > { %v1151_v63 = vrot.slane %v3386_v23, 2  ;;  %v361_v25 = vmul.f32 %v2954_v3, %v3195_v57  ;;  %v402_v42 = vmul.f32 %v2944_v1, %v3224_v16  ;;  %v527_v20 = vmul.f32 %v2949_v2, %v3224_v16 }
  0x7c   : > { %1211 = vst [vmem:[%s3090_s23 + $0x38] sm:$0xff] %v1193_v12  ;;  %v3399_v26 = vadd.f32 %v3312_v48, %v1193_v12  ;;  %v1243_v27 = vmul.f32 %v1193_v12, %v1193_v12  ;;  %v910_v35 = vadd.f32 %v868_v22, %v786_v15  ;;  %v1028_v29 = vsel %vm436_vm0, %v1026_v54, %v1027_v0  ;;  %v3411_v48 = vld [vmem:[%s2935_s24 + $0xa0] sm:$0x3] }
  0x7d   : > { %v460_v18 = vrot.slane %v402_v42, 1  ;;  %v585_v30 = vrot.slane %v527_v20, 2  ;;  %v647_v7 = vmul.f32 %v2980_v13, %v3280_v6  ;;  %v688_v57 = vmul.f32 %v2959_v4, %v3323_v49 }
  0x7e   : > { %v3407_v51 = vadd.f32 %v3320_v58, %v1243_v27  ;;  %v946_v16 = vadd.f32 %v930_v60, %v910_v35  ;;  %v1152_v38 = vsel %vm561_vm1, %v1150_v62, %v1151_v63  ;;  %v812_v34 = vmul.f32 %v2964_v5, %v3323_v49 }
  0x7f   : > { %v461_v8 = vsel %vm436_vm0, %v458_v32, %v460_v18  ;;  %v586_v43 = vsel %vm561_vm1, %v583_v33, %v585_v30  ;;  %v745_v21 = vrot.slane %v688_v57, 1  ;;  %v972_v36 = vmul.f32 %v2985_v14, %v3411_v48  ;;  %v3456_v30 = vld [vmem:[%s2935_s24 + $0xa8] sm:$0xff] }
  0x80   : > { %v1070_v44 = vadd.f32 %v1028_v29, %v946_v16  ;;  %v502_v58 = vadd.f32 %v461_v8, %v361_v25  ;;  %v869_v45 = vrot.slane %v812_v34, 2  ;;  %v1096_v46 = vmul.f32 %v3003_v24, %v3411_v48  ;;  %v3460_v34 = vld [vmem:[%s2935_s24 + $0xb0] sm:$0xff] }
  0x81   : > { %v746_v52 = vsel %vm436_vm0, %v743_v37, %v745_v21  ;;  %v931_v59 = vmul.f32 %v2996_v19, %v3374_v9  ;;  %v1029_v53 = vrot.slane %v972_v36, 1  ;;  %v403_v32 = vmul.f32 %v2944_v1, %v3273_v50 }
  0x82   : > { %v1194_v33 = vadd.f32 %v1152_v38, %v1070_v44  ;;  %v627_v55 = vadd.f32 %v586_v43, %v502_v58  ;;  %v870_v11 = vsel %vm561_vm1, %v867_v40, %v869_v45  ;;  %v362_v10 = vmul.f32 %v2954_v3, %v3273_v50 }
  0x83   : > { %v1153_v56 = vrot.slane %v1096_v46, 2  ;;  %v404_v61 = vmul.f32 %v2944_v1, %v3280_v6  ;;  %v462_v47 = vrot.slane %v403_v32, 1  ;;  %v528_v37 = vmul.f32 %v2949_v2, %v3273_v50 }
  0x84   : > { %1212 = vst [vmem:[%s3090_s23 + $0x40] sm:$0xff] %v1194_v33  ;;  %v3435_v28 = vadd.f32 %v3350_v31, %v1194_v33  ;;  %v1244_v17 = vmul.f32 %v1194_v33, %v1194_v33  ;;  %v663_v22 = vadd.f32 %v647_v7, %v627_v55  ;;  %v1030_v54 = vsel %vm436_vm0, %v1027_v0, %v1029_v53 }
  0x85   : > { %v463_v40 = vrot.slane %v404_v61, 1  ;;  %v529_v23 = vmul.f32 %v2949_v2, %v3280_v6  ;;  %v587_v12 = vrot.slane %v528_v37, 2  ;;  %v648_v15 = vmul.f32 %v2980_v13, %v3371_v39 }
  0x86   : > { %v3443_v60 = vadd.f32 %v3358_v41, %v1244_v17  ;;  %v787_v50 = vadd.f32 %v746_v52, %v663_v22  ;;  %v689_v31 = vmul.f32 %v2959_v4, %v3371_v39  ;;  %v690_v0 = vmul.f32 %v2959_v4, %v3374_v9 }
  0x87   : > { %v464_v62 = vsel %vm436_vm0, %v462_v47, %v463_v40  ;;  %v588_v25 = vrot.slane %v529_v23, 2  ;;  %v813_v42 = vmul.f32 %v2964_v5, %v3371_v39  ;;  %v814_v20 = vmul.f32 %v2964_v5, %v3374_v9 }
  0x88   : > { %v911_v27 = vadd.f32 %v870_v11, %v787_v50  ;;  %v503_v41 = vadd.f32 %v464_v62, %v362_v10  ;;  %v747_v35 = vrot.slane %v689_v31, 1  ;;  %v748_v29 = vrot.slane %v690_v0, 1 }
  0x89   : > { %v1154_v18 = vsel %vm561_vm1, %v1151_v63, %v1153_v56  ;;  %v589_v7 = vsel %vm561_vm1, %v587_v12, %v588_v25  ;;  %v871_v57 = vrot.slane %v813_v42, 2  ;;  %v872_v16 = vrot.slane %v814_v20, 2  ;;  %v3502_v42 = vld [vmem:[%s2935_s24 + $0xb8] sm:$0x3] }
  0x8a   : > { %v947_v38 = vadd.f32 %v931_v59, %v911_v27  ;;  %v628_v8 = vadd.f32 %v589_v7, %v503_v41  ;;  %v932_v43 = vmul.f32 %v2996_v19, %v3456_v30  ;;  %v973_v21 = vmul.f32 %v2985_v14, %v3456_v30 }
  0x8b   : > { %v749_v36 = vsel %vm436_vm0, %v747_v35, %v748_v29  ;;  %v974_v63 = vmul.f32 %v2985_v14, %v3460_v34  ;;  %v1097_v44 = vmul.f32 %v3003_v24, %v3456_v30  ;;  %v3473_v58 = vmul.f32 %v3003_v24, %v3460_v34 }
  0x8c   : > { %v1071_v45 = vadd.f32 %v1030_v54, %v947_v38  ;;  %v664_v46 = vadd.f32 %v648_v15, %v628_v8  ;;  %v873_v52 = vsel %vm561_vm1, %v871_v57, %v872_v16  ;;  %v1031_v59 = vrot.slane %v973_v21, 1 }
  0x8d   : > { %v1032_v53 = vrot.slane %v974_v63, 1  ;;  %v1155_v32 = vrot.slane %v1097_v44, 2  ;;  %v1156_v33 = vrot.slane %v3473_v58, 2  ;;  %v405_v55 = vmul.f32 %v2944_v1, %v3323_v49 }
  0x8e   : > { %v1195_v11 = vadd.f32 %v1154_v18, %v1071_v45  ;;  %v788_v10 = vadd.f32 %v749_v36, %v664_v46  ;;  %v363_v56 = vmul.f32 %v2954_v3, %v3280_v6  ;;  %v530_v61 = vmul.f32 %v2949_v2, %v3323_v49 }
  0x8f   : > { %v1033_v47 = vsel %vm436_vm0, %v1031_v59, %v1032_v53  ;;  %v465_v37 = vrot.slane %v405_v55, 1  ;;  %v649_v17 = vmul.f32 %v2980_v13, %v3374_v9  ;;  %v691_v22 = vmul.f32 %v2959_v4, %v3411_v48 }
  0x90   : > { %1213 = vst [vmem:[%s3090_s23 + $0x48] sm:$0xff] %v1195_v11  ;;  %v3490_v54 = vadd.f32 %v3399_v26, %v1195_v11  ;;  %v1245_v23 = vmul.f32 %v1195_v11, %v1195_v11  ;;  %v912_v12 = vadd.f32 %v873_v52, %v788_v10  ;;  %v590_v6 = vrot.slane %v530_v61, 2 }
  0x91   : > { %v1157_v49 = vsel %vm561_vm1, %v1155_v32, %v1156_v33  ;;  %v466_v15 = vsel %vm436_vm0, %v463_v40, %v465_v37  ;;  %v750_v50 = vrot.slane %v691_v22, 1  ;;  %v815_v31 = vmul.f32 %v2964_v5, %v3411_v48  ;;  %v3562_v22 = vld [vmem:[%s2935_s24 + $0xc8] sm:$0xff] }
  0x92   : > { %v3499_v0 = vadd.f32 %v3407_v51, %v1245_v23  ;;  %v948_v62 = vadd.f32 %v932_v43, %v912_v12  ;;  %v504_v26 = vadd.f32 %v466_v15, %v363_v56  ;;  %v591_v20 = vsel %vm561_vm1, %v588_v25, %v590_v6 }
  0x93   : > { %v874_v27 = vrot.slane %v815_v31, 2  ;;  %v933_v41 = vmul.f32 %v2996_v19, %v3460_v34  ;;  %v975_v40 = vmul.f32 %v2985_v14, %v3502_v42  ;;  %v1099_v35 = vmul.f32 %v3003_v24, %v3502_v42 }
  0x94   : > { %v1072_v18 = vadd.f32 %v1033_v47, %v948_v62  ;;  %v629_v51 = vadd.f32 %v591_v20, %v504_v26  ;;  %v751_v7 = vsel %vm436_vm0, %v748_v29, %v750_v50  ;;  %v406_v57 = vmul.f32 %v2944_v1, %v3371_v39 }
  0x95   : > { %v875_v25 = vsel %vm561_vm1, %v872_v16, %v874_v27  ;;  %v1034_v38 = vrot.slane %v975_v40, 1  ;;  %v364_v8 = vmul.f32 %v2954_v3, %v3371_v39  ;;  %v3519_v43 = vmul.f32 %v2944_v1, %v3374_v9 }
  0x96   : > { %v1196_v21 = vadd.f32 %v1157_v49, %v1072_v18  ;;  %v665_v36 = vadd.f32 %v649_v17, %v629_v51  ;;  %v467_v63 = vrot.slane %v406_v57, 1  ;;  %v531_v44 = vmul.f32 %v2949_v2, %v3371_v39  ;;  %v3559_v17 = vld [vmem:[%s2935_s24 + $0xc0] sm:$0xff] }
  0x97   : > { %v1035_v29 = vsel %vm436_vm0, %v1032_v53, %v1034_v38  ;;  %v1158_v45 = vrot.slane %v1099_v35, 2  ;;  %v468_v46 = vrot.slane %v3519_v43, 1  ;;  %v3527_v16 = vmul.f32 %v2949_v2, %v3374_v9  ;;  %v3587_v18 = vld [vmem:[%s4764_s1] ss:$0 sm:$0xff]  ;;  %v3654_v43 = vld [vmem:[%s4764_s1 + $0xa] ss:$0 sm:$0xff] }
  0x98   : > { %1214 = vst [vmem:[%s3090_s23 + $0x50] sm:$0xff] %v1196_v21  ;;  %v3531_v3 = vadd.f32 %v3435_v28, %v1196_v21  ;;  %v1246_v1 = vmul.f32 %v1196_v21, %v1196_v21  ;;  %v789_v52 = vadd.f32 %v751_v7, %v665_v36  ;;  %v592_v59 = vrot.slane %v531_v44, 2 }
  0x99   : > { %v469_v39 = vsel %vm436_vm0, %v467_v63, %v468_v46  ;;  %v593_v53 = vrot.slane %v3527_v16, 2  ;;  %v650_v32 = vmul.f32 %v2980_v13, %v3456_v30  ;;  %v692_v2 = vmul.f32 %v2959_v4, %v3456_v30  ;;  %v3613_v63 = vld [vmem:[%s4764_s1 + $0x4] ss:$0 sm:$0xff] }
  0x9a   : > { %v3542_v28 = vadd.f32 %v3443_v60, %v1246_v1  ;;  %v913_v55 = vadd.f32 %v875_v25, %v789_v52  ;;  %v505_v11 = vadd.f32 %v469_v39, %v364_v8  ;;  %v3546_v10 = vmul.f32 %v2959_v4, %v3460_v34  ;;  %v3631_v1 = vld [vmem:[%s2935_s24 + $0xd0] sm:$0x3]  ;;  %v3636_v52 = vld [vmem:[%s4764_s1 + $0x6] ss:$0 sm:$0xff] }
  0x9b   : > { %v594_v56 = vsel %vm561_vm1, %v592_v59, %v593_v53  ;;  %v752_v61 = vrot.slane %v692_v2, 1  ;;  %v816_v47 = vmul.f32 %v2964_v5, %v3456_v30  ;;  %v3553_v13 = vmul.f32 %v2964_v5, %v3460_v34  ;;  %v3647_v2 = vld [vmem:[%s4764_s1 + $0x9] ss:$0 sm:$0xff] }
  0x9c   : > { %v949_v37 = vadd.f32 %v933_v41, %v913_v55  ;;  %v1159_v60 = vsel %vm561_vm1, %v1156_v33, %v1158_v45  ;;  %v630_v4 = vadd.f32 %v594_v56, %v505_v11  ;;  %v753_v23 = vrot.slane %v3546_v10, 1 }
  0x9d   : > { %v876_v12 = vrot.slane %v816_v47, 2  ;;  %v877_v6 = vrot.slane %v3553_v13, 2  ;;  %v976_v49 = vmul.f32 %v2985_v14, %v3559_v17  ;;  %v3570_v5 = vmul.f32 %v2985_v14, %v3562_v22 }
  0x9e   : > { %v1073_v58 = vadd.f32 %v1035_v29, %v949_v37  ;;  %v666_v15 = vadd.f32 %v650_v32, %v630_v4  ;;  %v754_v33 = vsel %vm436_vm0, %v752_v61, %v753_v23  ;;  %v1100_v50 = vmul.f32 %v3003_v24, %v3559_v17  ;;  %v3662_v61 = vld [vmem:[%s4764_s1 + $0x8] ss:$0 sm:$0xff] }
  0x9f   : > { %v878_v31 = vsel %vm561_vm1, %v876_v12, %v877_v6  ;;  %v1036_v62 = vrot.slane %v976_v49, 1  ;;  %v1037_v26 = vrot.slane %v3570_v5, 1  ;;  %v3579_v20 = vmul.f32 %v3003_v24, %v3562_v22  ;;  %v3594_v24 = vld [vmem:[%s4764_s1 + $0x1] ss:$0 sm:$0xff] }
  0xa0   : > { %v1197_v27 = vadd.f32 %v1159_v60, %v1073_v58  ;;  %v790_v14 = vadd.f32 %v754_v33, %v666_v15  ;;  %v934_v41 = vmul.f32 %v2996_v19, %v3559_v17  ;;  %v1160_v40 = vrot.slane %v1100_v50, 2  ;;  %v3601_v19 = vld [vmem:[%s4764_s1 + $0x2] ss:$0 sm:$0xff] }
  0xa1   : > { %v1161_v35 = vrot.slane %v3579_v20, 2  ;;  %v365_v51 = vmul.f32 %v3587_v18, %v3374_v9  ;;  %v408_v7 = vmul.f32 %v3594_v24, %v3411_v48  ;;  %v533_v57 = vmul.f32 %v3601_v19, %v3411_v48  ;;  %v3620_v48 = vld [vmem:[%s4764_s1 + $0x5] ss:$0 sm:$0xff] }
  0xa2   : > { %1215 = vst [vmem:[%s3090_s23 + $0x58] sm:$0xff] %v1197_v27  ;;  %v3607_v9 = vadd.f32 %v3490_v54, %v1197_v27  ;;  %v1247_v25 = vmul.f32 %v1197_v27, %v1197_v27  ;;  %v914_v38 = vadd.f32 %v878_v31, %v790_v14  ;;  %v1038_v8 = vsel %vm436_vm0, %v1036_v62, %v1037_v26 }
  0xa3   : > { %v470_v21 = vrot.slane %v408_v7, 1  ;;  %v595_v36 = vrot.slane %v533_v57, 2  ;;  %v651_v44 = vmul.f32 %v3613_v63, %v3460_v34  ;;  %v694_v54 = vmul.f32 %v3620_v48, %v3502_v42 }
  0xa4   : > { %v3625_v29 = vadd.f32 %v3499_v0, %v1247_v25  ;;  %v950_v45 = vadd.f32 %v934_v41, %v914_v38  ;;  %v1162_v16 = vsel %vm561_vm1, %v1160_v40, %v1161_v35  ;;  %v818_v59 = vmul.f32 %v3636_v52, %v3502_v42 }
  0xa5   : > { %v471_v0 = vsel %vm436_vm0, %v468_v46, %v470_v21  ;;  %v596_v39 = vsel %vm561_vm1, %v593_v53, %v595_v36  ;;  %v755_v32 = vrot.slane %v694_v54, 1  ;;  %v978_v55 = vmul.f32 %v3647_v2, %v3631_v1 }
  0xa6   : > { %v1074_v11 = vadd.f32 %v1038_v8, %v950_v45  ;;  %v506_v10 = vadd.f32 %v471_v0, %v365_v51  ;;  %v879_v56 = vrot.slane %v818_v59, 2  ;;  %v1102_v46 = vmul.f32 %v3654_v43, %v3631_v1  ;;  %v3707_v0 = vld [vmem:[%s2935_s24 + $0xe0] sm:$0xff] }
  0xa7   : > { %v756_v53 = vsel %vm436_vm0, %v753_v23, %v755_v32  ;;  %v935_v47 = vmul.f32 %v3662_v61, %v3562_v22  ;;  %v1039_v13 = vrot.slane %v978_v55, 1  ;;  %v409_v37 = vmul.f32 %v3594_v24, %v3456_v30 }
  0xa8   : > { %v1198_v60 = vadd.f32 %v1162_v16, %v1074_v11  ;;  %v631_v4 = vadd.f32 %v596_v39, %v506_v10  ;;  %v880_v12 = vsel %vm561_vm1, %v877_v6, %v879_v56  ;;  %v366_v49 = vmul.f32 %v3587_v18, %v3456_v30 }
  0xa9   : > { %v1163_v23 = vrot.slane %v1102_v46, 2  ;;  %v3673_v5 = vmul.f32 %v3594_v24, %v3460_v34  ;;  %v472_v58 = vrot.slane %v409_v37, 1  ;;  %v534_v15 = vmul.f32 %v3601_v19, %v3456_v30 }
  0xaa   : > { %1216 = vst [vmem:[%s3090_s23 + $0x60] sm:$0xff] %v1198_v60  ;;  %v3679_v33 = vadd.f32 %v3531_v3, %v1198_v60  ;;  %v1248_v50 = vmul.f32 %v1198_v60, %v1198_v60  ;;  %v667_v31 = vadd.f32 %v651_v44, %v631_v4  ;;  %v1040_v6 = vsel %vm436_vm0, %v1037_v26, %v1039_v13  ;;  %v3703_v44 = vld [vmem:[%s2935_s24 + $0xd8] sm:$0xff] }
  0xab   : > { %v473_v62 = vrot.slane %v3673_v5, 1  ;;  %v535_v27 = vmul.f32 %v3601_v19, %v3460_v34  ;;  %v597_v14 = vrot.slane %v534_v15, 2  ;;  %v652_v41 = vmul.f32 %v3613_v63, %v3559_v17 }
  0xac   : > { %v3688_v30 = vadd.f32 %v3542_v28, %v1248_v50  ;;  %v791_v40 = vadd.f32 %v756_v53, %v667_v31  ;;  %v695_v3 = vmul.f32 %v3620_v48, %v3559_v17  ;;  %v696_v26 = vmul.f32 %v3620_v48, %v3562_v22 }
  0xad   : > { %v474_v51 = vsel %vm436_vm0, %v472_v58, %v473_v62  ;;  %v598_v7 = vrot.slane %v535_v27, 2  ;;  %v819_v57 = vmul.f32 %v3636_v52, %v3559_v17  ;;  %v820_v25 = vmul.f32 %v3636_v52, %v3562_v22 }
  0xae   : > { %v915_v38 = vadd.f32 %v880_v12, %v791_v40  ;;  %v507_v28 = vadd.f32 %v474_v51, %v366_v49  ;;  %v757_v8 = vrot.slane %v695_v3, 1  ;;  %v758_v21 = vrot.slane %v696_v26, 1 }
  0xaf   : > { %v1164_v36 = vsel %vm561_vm1, %v1161_v35, %v1163_v23  ;;  %v599_v54 = vsel %vm561_vm1, %v597_v14, %v598_v7  ;;  %v881_v45 = vrot.slane %v819_v57, 2  ;;  %v882_v16 = vrot.slane %v820_v25, 2 }
  0xb0   : > { %v951_v59 = vadd.f32 %v935_v47, %v915_v38  ;;  %v632_v39 = vadd.f32 %v599_v54, %v507_v28  ;;  %v936_v32 = vmul.f32 %v3662_v61, %v3703_v44  ;;  %v979_v55 = vmul.f32 %v3647_v2, %v3703_v44 }
  0xb1   : > { %v759_v20 = vsel %vm436_vm0, %v757_v8, %v758_v21  ;;  %v980_v35 = vmul.f32 %v3647_v2, %v3707_v0  ;;  %v1103_v11 = vmul.f32 %v3654_v43, %v3703_v44  ;;  %v3720_v10 = vmul.f32 %v3654_v43, %v3707_v0 }
  0xb2   : > { %v1075_v56 = vadd.f32 %v1040_v6, %v951_v59  ;;  %v668_v46 = vadd.f32 %v652_v41, %v632_v39  ;;  %v883_v53 = vsel %vm561_vm1, %v881_v45, %v882_v16  ;;  %v1041_v47 = vrot.slane %v979_v55, 1  ;;  %v347_v41 = vld [vmem:[%s2935_s24 + $0xe8] sm:$0x3] }
  0xb3   : > { %v1042_v13 = vrot.slane %v980_v35, 1  ;;  %v1165_v37 = vrot.slane %v1103_v11, 2  ;;  %v1166_v60 = vrot.slane %v3720_v10, 2  ;;  %v411_v4 = vmul.f32 %v3594_v24, %v3502_v42 }
  0xb4   : > { %v1199_v12 = vadd.f32 %v1164_v36, %v1075_v56  ;;  %v792_v49 = vadd.f32 %v759_v20, %v668_v46  ;;  %v367_v23 = vmul.f32 %v3587_v18, %v3460_v34  ;;  %v536_v5 = vmul.f32 %v3601_v19, %v3502_v42 }
  0xb5   : > { %v1043_v58 = vsel %vm436_vm0, %v1041_v47, %v1042_v13  ;;  %v475_v15 = vrot.slane %v411_v4, 1  ;;  %v653_v50 = vmul.f32 %v3613_v63, %v3562_v22  ;;  %v697_v31 = vmul.f32 %v3620_v48, %v3631_v1 }
  0xb6   : > { %1217 = vst [vmem:[%s3090_s23 + $0x68] sm:$0xff] %v1199_v12  ;;  %v3737_v6 = vadd.f32 %v3607_v9, %v1199_v12  ;;  %v1249_v27 = vmul.f32 %v1199_v12, %v1199_v12  ;;  %v916_v14 = vadd.f32 %v883_v53, %v792_v49  ;;  %v600_v34 = vrot.slane %v536_v5, 2 }
  0xb7   : > { %v1167_v42 = vsel %vm561_vm1, %v1165_v37, %v1166_v60  ;;  %v476_v40 = vsel %vm436_vm0, %v473_v62, %v475_v15  ;;  %v760_v3 = vrot.slane %v697_v31, 1  ;;  %v821_v26 = vmul.f32 %v3636_v52, %v3631_v1 }
  0xb8   : > { %v3747_v51 = vadd.f32 %v3625_v29, %v1249_v27  ;;  %v952_v57 = vadd.f32 %v936_v32, %v916_v14  ;;  %v508_v9 = vadd.f32 %v476_v40, %v367_v23  ;;  %v601_v25 = vsel %vm561_vm1, %v598_v7, %v600_v34  ;;  %v3796_v14 = vld [vmem:[%s2935_s24 + $0xf0] sm:$0xff] }
  0xb9   : > { %v884_v38 = vrot.slane %v821_v26, 2  ;;  %v937_v28 = vmul.f32 %v3662_v61, %v3707_v0  ;;  %v981_v8 = vmul.f32 %v3647_v2, %v347_v41  ;;  %v1105_v36 = vmul.f32 %v3654_v43, %v347_v41  ;;  %v3799_v41 = vld [vmem:[%s2935_s24 + $0xf8] sm:$0xff] }
  0xba   : > { %v1076_v62 = vadd.f32 %v1043_v58, %v952_v57  ;;  %v633_v54 = vadd.f32 %v601_v25, %v508_v9  ;;  %v761_v1 = vsel %vm436_vm0, %v758_v21, %v760_v3  ;;  %v1331_v29 = vmul.f32 %v3594_v24, %v3559_v17 }
  0xbb   : > { %v885_v45 = vsel %vm561_vm1, %v882_v16, %v884_v38  ;;  %v1044_v59 = vrot.slane %v981_v8, 1  ;;  %v1299_v7 = vmul.f32 %v3587_v18, %v3559_v17  ;;  %v3762_v39 = vmul.f32 %v3594_v24, %v3562_v22  ;;  %v2579_v38 = vld [vmem:[%s2935_s24 + $0xd0] sm:$0x3] }
  0xbc   : > { %v1200_v32 = vadd.f32 %v1167_v42, %v1076_v62  ;;  %v669_v55 = vadd.f32 %v653_v50, %v633_v54  ;;  %v1379_v20 = vrot.slane %v1331_v29, 1  ;;  %v1451_v35 = vmul.f32 %v3601_v19, %v3559_v17 }
  0xbd   : > { %v1045_v21 = vsel %vm436_vm0, %v1042_v13, %v1044_v59  ;;  %v1168_v11 = vrot.slane %v1105_v36, 2  ;;  %v1380_v56 = vrot.slane %v3762_v39, 1  ;;  %v3770_v16 = vmul.f32 %v3601_v19, %v3562_v22 }
  0xbe   : > { %1218 = vst [vmem:[%s3090_s23 + $0x70] sm:$0xff] %v1200_v32  ;;  %v3774_v46 = vadd.f32 %v3679_v33, %v1200_v32  ;;  %v1250_v53 = vmul.f32 %v1200_v32, %v1200_v32  ;;  %v793_v47 = vadd.f32 %v761_v1, %v669_v55  ;;  %v1499_v37 = vrot.slane %v1451_v35, 2 }
  0xbf   : > { %v1381_v17 = vsel %vm436_vm0, %v1379_v20, %v1380_v56  ;;  %v1500_v13 = vrot.slane %v3770_v16, 2  ;;  %v1571_v4 = vmul.f32 %v3613_v63, %v3703_v44  ;;  %v1603_v12 = vmul.f32 %v3620_v48, %v3703_v44 }
  0xc0   : > { %v3783_v49 = vadd.f32 %v3688_v30, %v1250_v53  ;;  %v917_v33 = vadd.f32 %v885_v45, %v793_v47  ;;  %v1435_v23 = vadd.f32 %v1381_v17, %v1299_v7  ;;  %v1604_v5 = vmul.f32 %v3620_v48, %v3707_v0 }
  0xc1   : > { %v1501_v58 = vsel %vm561_vm1, %v1499_v37, %v1500_v13  ;;  %v1651_v15 = vrot.slane %v1603_v12, 1  ;;  %v1723_v50 = vmul.f32 %v3636_v52, %v3703_v44  ;;  %v1724_v31 = vmul.f32 %v3636_v52, %v3707_v0 }
  0xc2   : > { %v953_v27 = vadd.f32 %v937_v28, %v917_v33  ;;  %v1169_v30 = vsel %vm561_vm1, %v1166_v60, %v1168_v11  ;;  %v1555_v34 = vadd.f32 %v1501_v58, %v1435_v23  ;;  %v1652_v42 = vrot.slane %v1604_v5, 1  ;;  %v3824_v11 = vld [vmem:[%s2935_s24 + $0xe8] sm:$0x3] }
  0xc3   : > { %v1771_v40 = vrot.slane %v1723_v50, 2  ;;  %v1772_v3 = vrot.slane %v1724_v31, 2  ;;  %v1875_v26 = vmul.f32 %v3647_v2, %v3796_v14  ;;  %v1876_v57 = vmul.f32 %v3647_v2, %v3799_v41 }
  0xc4   : > { %v1077_v9 = vadd.f32 %v1045_v21, %v953_v27  ;;  %v1587_v25 = vadd.f32 %v1571_v4, %v1555_v34  ;;  %v1653_v10 = vsel %vm436_vm0, %v1651_v15, %v1652_v42  ;;  %v1995_v60 = vmul.f32 %v3654_v43, %v3796_v14  ;;  %v3835_v4 = vld [vmem:[%s2935_s24 + $0x100] sm:$0x3] }
  0xc5   : > { %v1773_v28 = vsel %vm561_vm1, %v1771_v40, %v1772_v3  ;;  %v1923_v8 = vrot.slane %v1875_v26, 1  ;;  %v1924_v36 = vrot.slane %v1876_v57, 1  ;;  %v1996_v62 = vmul.f32 %v3654_v43, %v3799_v41 }
  0xc6   : > { %v1201_v54 = vadd.f32 %v1169_v30, %v1077_v9  ;;  %v1707_v1 = vadd.f32 %v1653_v10, %v1587_v25  ;;  %v1843_v29 = vmul.f32 %v3662_v61, %v3796_v14  ;;  %v2043_v45 = vrot.slane %v1995_v60, 2 }
  0xc7   : > { %v2044_v59 = vrot.slane %v1996_v62, 2  ;;  %v1300_v7 = vmul.f32 %v3587_v18, %v3562_v22  ;;  %v1333_v39 = vmul.f32 %v3594_v24, %v2579_v38  ;;  %v1453_v32 = vmul.f32 %v3601_v19, %v2579_v38 }
  0xc8   : > { %1219 = vst [vmem:[%s3090_s23 + $0x78] sm:$0xff] %v1201_v54  ;;  %v3820_v55 = vadd.f32 %v3737_v6, %v1201_v54  ;;  %v1251_v20 = vmul.f32 %v1201_v54, %v1201_v54  ;;  %v1827_v35 = vadd.f32 %v1773_v28, %v1707_v1  ;;  %v1925_v21 = vsel %vm436_vm0, %v1923_v8, %v1924_v36 }
  0xc9   : > { %v1382_v16 = vrot.slane %v1333_v39, 1  ;;  %v1502_v53 = vrot.slane %v1453_v32, 2  ;;  %v1572_v22 = vmul.f32 %v3613_v63, %v3707_v0  ;;  %v1605_v47 = vmul.f32 %v3620_v48, %v3824_v11 }
  0xca   : > { %v3831_v37 = vadd.f32 %v3747_v51, %v1251_v20  ;;  %v1859_v17 = vadd.f32 %v1843_v29, %v1827_v35  ;;  %v2045_v6 = vsel %vm561_vm1, %v2043_v45, %v2044_v59  ;;  %v1725_v12 = vmul.f32 %v3636_v52, %v3824_v11  ;;  %v3881_v35 = vld [vmem:[%s2935_s24 + $0x108] sm:$0xff] }
  0xcb   : > { %v1383_v33 = vsel %vm436_vm0, %v1380_v56, %v1382_v16  ;;  %v1503_v23 = vsel %vm561_vm1, %v1500_v13, %v1502_v53  ;;  %v1654_v5 = vrot.slane %v1605_v47, 1  ;;  %v1877_v58 = vmul.f32 %v3647_v2, %v3835_v4 }
  0xcc   : > { %v1979_v15 = vadd.f32 %v1925_v21, %v1859_v17  ;;  %v1436_v51 = vadd.f32 %v1383_v33, %v1300_v7  ;;  %v1774_v50 = vrot.slane %v1725_v12, 2  ;;  %v1997_v31 = vmul.f32 %v3654_v43, %v3835_v4  ;;  %v3884_v21 = vld [vmem:[%s2935_s24 + $0x110] sm:$0xff] }
  0xcd   : > { %v1655_v27 = vsel %vm436_vm0, %v1652_v42, %v1654_v5  ;;  %v1844_v30 = vmul.f32 %v3662_v61, %v3799_v41  ;;  %v1926_v34 = vrot.slane %v1877_v58, 1  ;;  %v1334_v56 = vmul.f32 %v3594_v24, %v3703_v44 }
  0xce   : > { %v3850_v13 = vadd.f32 %v2045_v6, %v1979_v15  ;;  %v1556_v40 = vadd.f32 %v1503_v23, %v1436_v51  ;;  %v2046_v26 = vrot.slane %v1997_v31, 2  ;;  %v1301_v57 = vmul.f32 %v3587_v18, %v3703_v44 }
  0xcf   : > { %v1775_v9 = vsel %vm561_vm1, %v1772_v3, %v1774_v50  ;;  %v1335_v25 = vmul.f32 %v3594_v24, %v3707_v0  ;;  %v1384_v42 = vrot.slane %v1334_v56, 1  ;;  %v1454_v10 = vmul.f32 %v3601_v19, %v3703_v44 }
  0xd0   : > { %2608 = vst [vmem:[%s3090_s23 + $0x80] sm:$0xff] %v3850_v13  ;;  %v3863_v60 = vmul.f32 %v3850_v13, %v3850_v13  ;;  %v1588_v38 = vadd.f32 %v1572_v22, %v1556_v40  ;;  %v1927_v28 = vsel %vm436_vm0, %v1924_v36, %v1926_v34  ;;  %v1455_v3 = vmul.f32 %v3601_v19, %v3707_v0 }
  0xd1   : > { %v2047_v8 = vsel %vm561_vm1, %v2044_v59, %v2046_v26  ;;  %v1385_v62 = vrot.slane %v1335_v25, 1  ;;  %v1504_v54 = vrot.slane %v1454_v10, 2  ;;  %v1606_v44 = vmul.f32 %v3620_v48, %v3796_v14 }
  0xd2   : > { %v1708_v1 = vadd.f32 %v1655_v27, %v1588_v38  ;;  %v1505_v29 = vrot.slane %v1455_v3, 2  ;;  %v1607_v45 = vmul.f32 %v3620_v48, %v3799_v41  ;;  %v1726_v7 = vmul.f32 %v3636_v52, %v3796_v14 }
  0xd3   : > { %v1386_v36 = vsel %vm436_vm0, %v1384_v42, %v1385_v62  ;;  %v1573_v39 = vmul.f32 %v3613_v63, %v3796_v14  ;;  %v1656_v32 = vrot.slane %v1606_v44, 1  ;;  %v1727_v59 = vmul.f32 %v3636_v52, %v3799_v41 }
  0xd4   : > { %v1828_v20 = vadd.f32 %v1775_v9, %v1708_v1  ;;  %v1437_v16 = vadd.f32 %v1386_v36, %v1301_v57  ;;  %v1506_v53 = vsel %vm561_vm1, %v1504_v54, %v1505_v29  ;;  %v1657_v22 = vrot.slane %v1607_v45, 1  ;;  %v3925_v1 = vld [vmem:[%s2935_s24 + $0x118] sm:$0x3] }
  0xd5   : > { %v1776_v47 = vrot.slane %v1726_v7, 2  ;;  %v1777_v17 = vrot.slane %v1727_v59, 2  ;;  %v1878_v6 = vmul.f32 %v3647_v2, %v3881_v35  ;;  %v1879_v12 = vmul.f32 %v3647_v2, %v3884_v21 }
  0xd6   : > { %v1860_v33 = vadd.f32 %v1844_v30, %v1828_v20  ;;  %v1557_v23 = vadd.f32 %v1506_v53, %v1437_v16  ;;  %v1845_v5 = vmul.f32 %v3662_v61, %v3881_v35  ;;  %v1998_v58 = vmul.f32 %v3654_v43, %v3881_v35 }
  0xd7   : > { %v1658_v15 = vsel %vm436_vm0, %v1656_v32, %v1657_v22  ;;  %v1928_v51 = vrot.slane %v1878_v6, 1  ;;  %v1929_v50 = vrot.slane %v1879_v12, 1  ;;  %v3898_v31 = vmul.f32 %v3654_v43, %v3884_v21 }
  0xd8   : > { %v1980_v27 = vadd.f32 %v1927_v28, %v1860_v33  ;;  %v1589_v34 = vadd.f32 %v1573_v39, %v1557_v23  ;;  %v1778_v30 = vsel %vm561_vm1, %v1776_v47, %v1777_v17  ;;  %v2048_v56 = vrot.slane %v1998_v58, 2 }
  0xd9   : > { %v2049_v40 = vrot.slane %v3898_v31, 2  ;;  %v1302_v26 = vmul.f32 %v3587_v18, %v3707_v0  ;;  %v1336_v57 = vmul.f32 %v3594_v24, %v3824_v11  ;;  %v1456_v9 = vmul.f32 %v3601_v19, %v3824_v11 }
  0xda   : > { %v3908_v25 = vadd.f32 %v2047_v8, %v1980_v27  ;;  %v1709_v42 = vadd.f32 %v1658_v15, %v1589_v34  ;;  %v1930_v10 = vsel %vm436_vm0, %v1928_v51, %v1929_v50  ;;  %v1608_v38 = vmul.f32 %v3620_v48, %v3835_v4 }
  0xdb   : > { %v1387_v28 = vrot.slane %v1336_v57, 1  ;;  %v1507_v3 = vrot.slane %v1456_v9, 2  ;;  %v1574_v54 = vmul.f32 %v3613_v63, %v3799_v41  ;;  %v1728_v0 = vmul.f32 %v3636_v52, %v3835_v4 }
  0xdc   : > { %2609 = vst [vmem:[%s3090_s23 + $0x88] sm:$0xff] %v3908_v25  ;;  %v3921_v11 = vmul.f32 %v3908_v25, %v3908_v25  ;;  %v1829_v8 = vadd.f32 %v1778_v30, %v1709_v42  ;;  %v2050_v44 = vsel %vm561_vm1, %v2048_v56, %v2049_v40  ;;  %v1659_v45 = vrot.slane %v1608_v38, 1 }
  0xdd   : > { %v1388_v7 = vsel %vm436_vm0, %v1385_v62, %v1387_v28  ;;  %v1508_v36 = vsel %vm561_vm1, %v1505_v29, %v1507_v3  ;;  %v1779_v39 = vrot.slane %v1728_v0, 2  ;;  %v1880_v32 = vmul.f32 %v3647_v2, %v3925_v1 }
  0xde   : > { %v1861_v59 = vadd.f32 %v1845_v5, %v1829_v8  ;;  %v1438_v20 = vadd.f32 %v1388_v7, %v1302_v26  ;;  %v1846_v16 = vmul.f32 %v3662_v61, %v3884_v21  ;;  %v2000_v53 = vmul.f32 %v3654_v43, %v3925_v1  ;;  %v3970_v8 = vld [vmem:[%s2935_s24 + $0x120] sm:$0xff]  ;;  %v3980_v7 = vld [vmem:[%s2935_s24 + $0x128] sm:$0xff] }
  0xdf   : > { %v1660_v47 = vsel %vm436_vm0, %v1657_v22, %v1659_v45  ;;  %v1780_v6 = vsel %vm561_vm1, %v1777_v17, %v1779_v39  ;;  %v1931_v12 = vrot.slane %v1880_v32, 1  ;;  %v1337_v62 = vmul.f32 %v3594_v24, %v3796_v14 }
  0xe0   : > { %v1981_v29 = vadd.f32 %v1930_v10, %v1861_v59  ;;  %v1558_v33 = vadd.f32 %v1508_v36, %v1438_v20  ;;  %v1303_v23 = vmul.f32 %v3587_v18, %v3796_v14  ;;  %v3943_v5 = vmul.f32 %v3594_v24, %v3799_v41 }
  0xe1   : > { %v2051_v58 = vrot.slane %v2000_v53, 2  ;;  %v1389_v15 = vrot.slane %v1337_v62, 1  ;;  %v1457_v22 = vmul.f32 %v3601_v19, %v3796_v14  ;;  %v3949_v17 = vmul.f32 %v3601_v19, %v3799_v41 }
  0xe2   : > { %v2101_v51 = vadd.f32 %v2050_v44, %v1981_v29  ;;  %v1590_v31 = vadd.f32 %v1574_v54, %v1558_v33  ;;  %v1932_v27 = vsel %vm436_vm0, %v1929_v50, %v1931_v12  ;;  %v1390_v34 = vrot.slane %v3943_v5, 1 }
  0xe3   : > { %v1509_v30 = vrot.slane %v1457_v22, 2  ;;  %v1510_v56 = vrot.slane %v3949_v17, 2  ;;  %v1575_v26 = vmul.f32 %v3613_v63, %v3881_v35  ;;  %v1609_v14 = vmul.f32 %v3620_v48, %v3881_v35 }
  0xe4   : > { %2610 = vst [vmem:[%s3090_s23 + $0x90] sm:$0xff] %v2101_v51  ;;  %v3960_v57 = vadd.f32 %v2101_v51, %v3850_v13  ;;  %v2151_v9 = vmul.f32 %v2101_v51, %v2101_v51  ;;  %v1710_v42 = vadd.f32 %v1660_v47, %v1590_v31  ;;  %v1391_v50 = vsel %vm436_vm0, %v1389_v15, %v1390_v34 }
  0xe5   : > { %v1439_v10 = vadd.f32 %v1391_v50, %v1303_v23  ;;  %v1511_v38 = vsel %vm561_vm1, %v1509_v30, %v1510_v56  ;;  %v1610_v28 = vmul.f32 %v3620_v48, %v3884_v21  ;;  %v1661_v3 = vrot.slane %v1609_v14, 1 }
  0xe6   : > { %v3967_v54 = vadd.f32 %v2151_v9, %v3863_v60  ;;  %v1830_v0 = vadd.f32 %v1780_v6, %v1710_v42  ;;  %v1729_v13 = vmul.f32 %v3636_v52, %v3881_v35  ;;  %v3976_v44 = vmul.f32 %v3636_v52, %v3884_v21 }
  0xe7   : > { %v2052_v45 = vsel %vm561_vm1, %v2049_v40, %v2051_v58  ;;  %v1559_v36 = vadd.f32 %v1511_v38, %v1439_v10  ;;  %v1662_v39 = vrot.slane %v1610_v28, 1  ;;  %v1881_v60 = vmul.f32 %v3647_v2, %v3970_v8 }
  0xe8   : > { %v1862_v32 = vadd.f32 %v1846_v16, %v1830_v0  ;;  %v1781_v59 = vrot.slane %v1729_v13, 2  ;;  %v1782_v20 = vrot.slane %v3976_v44, 2  ;;  %v1882_v53 = vmul.f32 %v3647_v2, %v3980_v7  ;;  %v4018_v13 = vld [vmem:[%s2935_s24 + $0x130] sm:$0x3] }
  0xe9   : > { %v1591_v47 = vadd.f32 %v1575_v26, %v1559_v36  ;;  %v1663_v6 = vsel %vm436_vm0, %v1661_v3, %v1662_v39  ;;  %v1933_v12 = vrot.slane %v1881_v60, 1  ;;  %v2001_v40 = vmul.f32 %v3654_v43, %v3970_v8 }
  0xea   : > { %v1982_v62 = vadd.f32 %v1932_v27, %v1862_v32  ;;  %v1783_v29 = vsel %vm561_vm1, %v1781_v59, %v1782_v20  ;;  %v1934_v33 = vrot.slane %v1882_v53, 1  ;;  %v2002_v16 = vmul.f32 %v3654_v43, %v3980_v7 }
  0xeb   : > { %v1711_v23 = vadd.f32 %v1663_v6, %v1591_v47  ;;  %v1847_v5 = vmul.f32 %v3662_v61, %v3970_v8  ;;  %v2053_v58 = vrot.slane %v2001_v40, 2  ;;  %v1339_v15 = vmul.f32 %v3594_v24, %v3835_v4 }
  0xec   : > { %v2102_v22 = vadd.f32 %v2052_v45, %v1982_v62  ;;  %v2054_v17 = vrot.slane %v2002_v16, 2  ;;  %v1304_v51 = vmul.f32 %v3587_v18, %v3799_v41  ;;  %v1459_v31 = vmul.f32 %v3601_v19, %v3835_v4 }
  0xed   : > { %v1831_v27 = vadd.f32 %v1783_v29, %v1711_v23  ;;  %v1935_v30 = vsel %vm436_vm0, %v1933_v12, %v1934_v33  ;;  %v1392_v26 = vrot.slane %v1339_v15, 1  ;;  %v1611_v14 = vmul.f32 %v3620_v48, %v3925_v1 }
  0xee   : > { %2611 = vst [vmem:[%s3090_s23 + $0x98] sm:$0xff] %v2102_v22  ;;  %v4006_v9 = vadd.f32 %v2102_v22, %v3908_v25  ;;  %v2152_v42 = vmul.f32 %v2102_v22, %v2102_v22  ;;  %v1512_v50 = vrot.slane %v1459_v31, 2  ;;  %v1576_v41 = vmul.f32 %v3613_v63, %v3884_v21 }
  0xef   : > { %v1863_v10 = vadd.f32 %v1847_v5, %v1831_v27  ;;  %v1393_v4 = vsel %vm436_vm0, %v1390_v34, %v1392_v26  ;;  %v1664_v38 = vrot.slane %v1611_v14, 1  ;;  %v1731_v28 = vmul.f32 %v3636_v52, %v3925_v1 }
  0xf0   : > { %v4014_v3 = vadd.f32 %v2152_v42, %v3921_v11  ;;  %v2055_v0 = vsel %vm561_vm1, %v2053_v58, %v2054_v17  ;;  %v1440_v25 = vadd.f32 %v1393_v4, %v1304_v51  ;;  %v1513_v44 = vsel %vm561_vm1, %v1510_v56, %v1512_v50  ;;  %v4057_v42 = vld [vmem:[%s2935_s24 + $0x138] sm:$0xff]  ;;  %v4066_v4 = vld [vmem:[%s2935_s24 + $0x140] sm:$0xff] }
  0xf1   : > { %v1983_v45 = vadd.f32 %v1935_v30, %v1863_v10  ;;  %v1784_v36 = vrot.slane %v1731_v28, 2  ;;  %v1848_v34 = vmul.f32 %v3662_v61, %v3980_v7  ;;  %v1883_v60 = vmul.f32 %v3647_v2, %v4018_v13 }
  0xf2   : > { %v1560_v32 = vadd.f32 %v1513_v44, %v1440_v25  ;;  %v1665_v11 = vsel %vm436_vm0, %v1662_v39, %v1664_v38  ;;  %v2003_v59 = vmul.f32 %v3654_v43, %v4018_v13  ;;  %v1340_v53 = vmul.f32 %v3594_v24, %v3881_v35 }
  0xf3   : > { %v2103_v47 = vadd.f32 %v2055_v0, %v1983_v45  ;;  %v1936_v56 = vrot.slane %v1883_v60, 1  ;;  %v1305_v6 = vmul.f32 %v3587_v18, %v3881_v35  ;;  %v4034_v12 = vmul.f32 %v3594_v24, %v3884_v21 }
  0xf4   : > { %v1592_v40 = vadd.f32 %v1576_v41, %v1560_v32  ;;  %v2056_v62 = vrot.slane %v2003_v59, 2  ;;  %v1394_v29 = vrot.slane %v1340_v53, 1  ;;  %v1460_v39 = vmul.f32 %v3601_v19, %v3881_v35 }
  0xf5   : > { %2612 = vst [vmem:[%s3090_s23 + $0xa0] sm:$0xff] %v2103_v47  ;;  %v4040_v16 = vadd.f32 %v3960_v57, %v2103_v47  ;;  %v2153_v23 = vmul.f32 %v2103_v47, %v2103_v47  ;;  %v1785_v5 = vsel %vm561_vm1, %v1782_v20, %v1784_v36  ;;  %v1395_v58 = vrot.slane %v4034_v12, 1 }
  0xf6   : > { %v1712_v15 = vadd.f32 %v1665_v11, %v1592_v40  ;;  %v1937_v22 = vsel %vm436_vm0, %v1934_v33, %v1936_v56  ;;  %v1461_v51 = vmul.f32 %v3601_v19, %v3884_v21  ;;  %v1514_v31 = vrot.slane %v1460_v39, 2 }
  0xf7   : > { %v4048_v35 = vadd.f32 %v3967_v54, %v2153_v23  ;;  %v2057_v57 = vsel %vm561_vm1, %v2054_v17, %v2056_v62  ;;  %v1396_v27 = vsel %vm436_vm0, %v1394_v29, %v1395_v58  ;;  %v1612_v20 = vmul.f32 %v3620_v48, %v3970_v8 }
  0xf8   : > { %v1832_v30 = vadd.f32 %v1785_v5, %v1712_v15  ;;  %v1441_v26 = vadd.f32 %v1396_v27, %v1305_v6  ;;  %v1515_v14 = vrot.slane %v1461_v51, 2  ;;  %v1613_v33 = vmul.f32 %v3620_v48, %v3980_v7 }
  0xf9   : > { %v1577_v50 = vmul.f32 %v3613_v63, %v3970_v8  ;;  %v1666_v54 = vrot.slane %v1612_v20, 1  ;;  %v1732_v17 = vmul.f32 %v3636_v52, %v3970_v8  ;;  %v1733_v41 = vmul.f32 %v3636_v52, %v3980_v7 }
  0xfa   : > { %v1864_v10 = vadd.f32 %v1848_v34, %v1832_v30  ;;  %v1516_v38 = vsel %vm561_vm1, %v1514_v31, %v1515_v14  ;;  %v1667_v28 = vrot.slane %v1613_v33, 1  ;;  %v1884_v0 = vmul.f32 %v3647_v2, %v4057_v42 }
  0xfb   : > { %v1561_v25 = vadd.f32 %v1516_v38, %v1441_v26  ;;  %v1786_v44 = vrot.slane %v1732_v17, 2  ;;  %v1787_v45 = vrot.slane %v1733_v41, 2  ;;  %v1885_v36 = vmul.f32 %v3647_v2, %v4066_v4 }
  0xfc   : > { %v1984_v60 = vadd.f32 %v1937_v22, %v1864_v10  ;;  %v1668_v32 = vsel %vm436_vm0, %v1666_v54, %v1667_v28  ;;  %v1938_v11 = vrot.slane %v1884_v0, 1  ;;  %v2004_v34 = vmul.f32 %v3654_v43, %v4057_v42 }
  0xfd   : > { %v1593_v59 = vadd.f32 %v1577_v50, %v1561_v25  ;;  %v1849_v53 = vmul.f32 %v3662_v61, %v4057_v42  ;;  %v1939_v47 = vrot.slane %v1885_v36, 1  ;;  %v4080_v56 = vmul.f32 %v3654_v43, %v4066_v4  ;;  %v4107_v50 = vld [vmem:[%s2935_s24 + $0x148] sm:$0x3] }
  0xfe   : > { %v2104_v6 = vadd.f32 %v2057_v57, %v1984_v60  ;;  %v1788_v12 = vsel %vm561_vm1, %v1786_v44, %v1787_v45  ;;  %v2058_v40 = vrot.slane %v2004_v34, 2  ;;  %v1342_v62 = vmul.f32 %v3594_v24, %v3925_v1 }
  0xff   : > { %v1713_v29 = vadd.f32 %v1668_v32, %v1593_v59  ;;  %v2059_v39 = vrot.slane %v4080_v56, 2  ;;  %v1306_v23 = vmul.f32 %v3587_v18, %v3884_v21  ;;  %v1462_v5 = vmul.f32 %v3601_v19, %v3925_v1 }
 0x100   : > { %2613 = vst [vmem:[%s3090_s23 + $0xa8] sm:$0xff] %v2104_v6  ;;  %v4092_v15 = vadd.f32 %v4006_v9, %v2104_v6  ;;  %v2154_v22 = vmul.f32 %v2104_v6, %v2104_v6  ;;  %v1940_v51 = vsel %vm436_vm0, %v1938_v11, %v1939_v47  ;;  %v1397_v31 = vrot.slane %v1342_v62, 1 }
 0x101   : > { %v1833_v57 = vadd.f32 %v1788_v12, %v1713_v29  ;;  %v1517_v27 = vrot.slane %v1462_v5, 2  ;;  %v1578_v20 = vmul.f32 %v3613_v63, %v3980_v7  ;;  %v1614_v21 = vmul.f32 %v3620_v48, %v4018_v13 }
 0x102   : > { %v4100_v30 = vadd.f32 %v4014_v3, %v2154_v22  ;;  %v2060_v1 = vsel %vm561_vm1, %v2058_v40, %v2059_v39  ;;  %v1398_v9 = vsel %vm436_vm0, %v1395_v58, %v1397_v31  ;;  %v1734_v26 = vmul.f32 %v3636_v52, %v4018_v13 }
 0x103   : > { %v1865_v33 = vadd.f32 %v1849_v53, %v1833_v57  ;;  %v1442_v54 = vadd.f32 %v1398_v9, %v1306_v23  ;;  %v1518_v17 = vsel %vm561_vm1, %v1515_v14, %v1517_v27  ;;  %v1669_v41 = vrot.slane %v1614_v21, 1 }
 0x104   : > { %v1789_v10 = vrot.slane %v1734_v26, 2  ;;  %v1850_v38 = vmul.f32 %v3662_v61, %v4066_v4  ;;  %v1886_v3 = vmul.f32 %v3647_v2, %v4107_v50  ;;  %v2006_v58 = vmul.f32 %v3654_v43, %v4107_v50 }
 0x105   : > { %v1985_v0 = vadd.f32 %v1940_v51, %v1865_v33  ;;  %v1562_v25 = vadd.f32 %v1518_v17, %v1442_v54  ;;  %v1307_v44 = vmul.f32 %v3587_v18, %v3970_v8  ;;  %v1343_v14 = vmul.f32 %v3594_v24, %v3970_v8  ;;  %v4158_v33 = vld [vmem:[%s2935_s24 + $0x158] sm:$0xff] }
 0x106   : > { %v1670_v36 = vsel %vm436_vm0, %v1667_v28, %v1669_v41  ;;  %v1790_v60 = vsel %vm561_vm1, %v1787_v45, %v1789_v10  ;;  %v1941_v32 = vrot.slane %v1886_v3, 1  ;;  %v4124_v11 = vmul.f32 %v3594_v24, %v3980_v7 }
 0x107   : > { %v2105_v34 = vadd.f32 %v2060_v1, %v1985_v0  ;;  %v1594_v59 = vadd.f32 %v1578_v20, %v1562_v25  ;;  %v1399_v53 = vrot.slane %v1343_v14, 1  ;;  %v1463_v56 = vmul.f32 %v3601_v19, %v3970_v8 }
 0x108   : > { %v1942_v6 = vsel %vm436_vm0, %v1939_v47, %v1941_v32  ;;  %v2061_v12 = vrot.slane %v2006_v58, 2  ;;  %v1400_v40 = vrot.slane %v4124_v11, 1  ;;  %v1464_v28 = vmul.f32 %v3601_v19, %v3980_v7 }
 0x109   : > { %2614 = vst [vmem:[%s3090_s23 + $0xb0] sm:$0xff] %v2105_v34  ;;  %v4134_v45 = vadd.f32 %v4040_v16, %v2105_v34  ;;  %v2155_v62 = vmul.f32 %v2105_v34, %v2105_v34  ;;  %v1714_v29 = vadd.f32 %v1670_v36, %v1594_v59  ;;  %v1519_v23 = vrot.slane %v1463_v56, 2 }
 0x10a   : > { %v1401_v5 = vsel %vm436_vm0, %v1399_v53, %v1400_v40  ;;  %v1520_v8 = vrot.slane %v1464_v28, 2  ;;  %v1579_v47 = vmul.f32 %v3613_v63, %v4057_v42  ;;  %v1615_v22 = vmul.f32 %v3620_v48, %v4057_v42 }
 0x10b   : > { %v4142_v51 = vadd.f32 %v4048_v35, %v2155_v62  ;;  %v1834_v31 = vadd.f32 %v1790_v60, %v1714_v29  ;;  %v1443_v16 = vadd.f32 %v1401_v5, %v1307_v44  ;;  %v1616_v57 = vmul.f32 %v3620_v48, %v4066_v4  ;;  %v4155_v35 = vld [vmem:[%s2935_s24 + $0x150] sm:$0xff] }
 0x10c   : > { %v1521_v27 = vsel %vm561_vm1, %v1519_v23, %v1520_v8  ;;  %v1671_v20 = vrot.slane %v1615_v22, 1  ;;  %v1735_v21 = vmul.f32 %v3636_v52, %v4057_v42  ;;  %v4151_v1 = vmul.f32 %v3636_v52, %v4066_v4 }
 0x10d   : > { %v1866_v9 = vadd.f32 %v1850_v38, %v1834_v31  ;;  %v2062_v26 = vsel %vm561_vm1, %v2059_v39, %v2061_v12  ;;  %v1563_v54 = vadd.f32 %v1521_v27, %v1443_v16  ;;  %v1672_v17 = vrot.slane %v1616_v57, 1 }
 0x10e   : > { %v1791_v41 = vrot.slane %v1735_v21, 2  ;;  %v1792_v10 = vrot.slane %v4151_v1, 2  ;;  %v1887_v3 = vmul.f32 %v3647_v2, %v4155_v35  ;;  %v4165_v58 = vmul.f32 %v3647_v2, %v4158_v33 }
 0x10f   : > { %v1986_v38 = vadd.f32 %v1942_v6, %v1866_v9  ;;  %v1595_v0 = vadd.f32 %v1579_v47, %v1563_v54  ;;  %v1673_v39 = vsel %vm436_vm0, %v1671_v20, %v1672_v17  ;;  %v2007_v25 = vmul.f32 %v3654_v43, %v4155_v35 }
 0x110   : > { %v1793_v44 = vsel %vm561_vm1, %v1791_v41, %v1792_v10  ;;  %v1943_v14 = vrot.slane %v1887_v3, 1  ;;  %v1944_v36 = vrot.slane %v4165_v58, 1  ;;  %v4174_v60 = vmul.f32 %v3654_v43, %v4158_v33  ;;  %v4242_v3 = vld [vmem:[%s4764_s1] ss:$0 sm:$0xff]  ;;  %v4297_v58 = vld [vmem:[%s4764_s1 + $0x9] ss:$0 sm:$0xff] }
 0x111   : > { %v2106_v32 = vadd.f32 %v2062_v26, %v1986_v38  ;;  %v1715_v11 = vadd.f32 %v1673_v39, %v1595_v0  ;;  %v1851_v34 = vmul.f32 %v3662_v61, %v4155_v35  ;;  %v2063_v59 = vrot.slane %v2007_v25, 2  ;;  %v4223_v26 = vld [vmem:[%s4764_s1 + $0x1] ss:$0 sm:$0xff] }
 0x112   : > { %v2064_v53 = vrot.slane %v4174_v60, 2  ;;  %v1345_v56 = vmul.f32 %v3594_v24, %v4018_v13  ;;  %v1465_v6 = vmul.f32 %v3601_v19, %v4018_v13  ;;  %v1308_v29 = vmul.f32 %v3587_v18, %v3980_v7  ;;  %v4205_v7 = vld [vmem:[%s2935_s24 + $0x160] sm:$0x3]  ;;  %v4307_v60 = vld [vmem:[%s4764_s1 + $0xa] ss:$0 sm:$0xff] }
 0x113   : > { %2615 = vst [vmem:[%s3090_s23 + $0xb8] sm:$0xff] %v2106_v32  ;;  %v4185_v12 = vadd.f32 %v4092_v15, %v2106_v32  ;;  %v2156_v28 = vmul.f32 %v2106_v32, %v2106_v32  ;;  %v1835_v62 = vadd.f32 %v1793_v44, %v1715_v11  ;;  %v1945_v23 = vsel %vm436_vm0, %v1943_v14, %v1944_v36 }
 0x114   : > { %v1402_v5 = vrot.slane %v1345_v56, 1  ;;  %v1522_v47 = vrot.slane %v1465_v6, 2  ;;  %v1617_v22 = vmul.f32 %v3620_v48, %v4107_v50  ;;  %v1580_v15 = vmul.f32 %v3613_v63, %v4066_v4  ;;  %v4271_v6 = vld [vmem:[%s4764_s1 + $0x6] ss:$0 sm:$0xff] }
 0x115   : > { %v4195_v19 = vadd.f32 %v4100_v30, %v2156_v28  ;;  %v1867_v13 = vadd.f32 %v1851_v34, %v1835_v62  ;;  %v1737_v31 = vmul.f32 %v3636_v52, %v4107_v50  ;;  %v2065_v18 = vsel %vm561_vm1, %v2063_v59, %v2064_v53 }
 0x116   : > { %v1403_v16 = vsel %vm436_vm0, %v1400_v40, %v1402_v5  ;;  %v1523_v48 = vsel %vm561_vm1, %v1520_v8, %v1522_v47  ;;  %v1674_v57 = vrot.slane %v1617_v22, 1  ;;  %v1889_v63 = vmul.f32 %v3647_v2, %v4205_v7 }
 0x117   : > { %v1987_v30 = vadd.f32 %v1945_v23, %v1867_v13  ;;  %v1444_v27 = vadd.f32 %v1403_v16, %v1308_v29  ;;  %v1794_v20 = vrot.slane %v1737_v31, 2  ;;  %v2009_v52 = vmul.f32 %v3654_v43, %v4205_v7  ;;  %v4284_v13 = vld [vmem:[%s2935_s24 + $0x168] sm:$0xff] }
 0x118   : > { %v1346_v21 = vmul.f32 %v3594_v24, %v4057_v42  ;;  %v1852_v40 = vmul.f32 %v3662_v61, %v4158_v33  ;;  %v1675_v8 = vsel %vm436_vm0, %v1672_v17, %v1674_v57  ;;  %v4227_v2 = vmul.f32 %v4223_v26, %v4066_v4  ;;  %v4232_v24 = vld [vmem:[%s4764_s1 + $0x2] ss:$0 sm:$0xff]  ;;  %v4292_v57 = vld [vmem:[%s2935_s24 + $0x170] sm:$0xff] }
 0x119   : > { %v4215_v1 = vadd.f32 %v2065_v18, %v1987_v30  ;;  %v1564_v9 = vadd.f32 %v1523_v48, %v1444_v27  ;;  %v1466_v61 = vmul.f32 %v4232_v24, %v4057_v42  ;;  %v1795_v17 = vsel %vm561_vm1, %v1792_v10, %v1794_v20  ;;  %v4252_v10 = vld [vmem:[%s4764_s1 + $0x4] ss:$0 sm:$0xff] }
 0x11a   : > { %v1404_v43 = vrot.slane %v1346_v21, 1  ;;  %v1946_v41 = vrot.slane %v1889_v63, 1  ;;  %v1309_v38 = vmul.f32 %v4242_v3, %v4057_v42  ;;  %v2066_v0 = vrot.slane %v2009_v52, 2  ;;  %v4259_v42 = vld [vmem:[%s4764_s1 + $0x5] ss:$0 sm:$0xff] }
 0x11b   : > { %2616 = vst [vmem:[%s3090_s23 + $0xc0] sm:$0xff] %v4215_v1  ;;  %v1596_v54 = vadd.f32 %v1580_v15, %v1564_v9  ;;  %v1405_v39 = vrot.slane %v4227_v2, 1  ;;  %v1467_v25 = vmul.f32 %v4232_v24, %v4066_v4  ;;  %v1524_v44 = vrot.slane %v1466_v61, 2  ;;  %v4318_v9 = vld [vmem:[%s4764_s1 + $0x8] ss:$0 sm:$0xff] }
 0x11c   : > { %v1581_v32 = vmul.f32 %v4252_v10, %v4155_v35  ;;  %v1618_v11 = vmul.f32 %v4259_v42, %v4155_v35  ;;  %v4265_v34 = vmul.f32 %v4259_v42, %v4158_v33  ;;  %v1738_v28 = vmul.f32 %v4271_v6, %v4155_v35 }
 0x11d   : > { %v1716_v14 = vadd.f32 %v1675_v8, %v1596_v54  ;;  %v1406_v59 = vsel %vm436_vm0, %v1404_v43, %v1405_v39  ;;  %v1525_v56 = vrot.slane %v1467_v25, 2  ;;  %v4277_v62 = vmul.f32 %v4271_v6, %v4158_v33 }
 0x11e   : > { %v1445_v23 = vadd.f32 %v1406_v59, %v1309_v38  ;;  %v1676_v5 = vrot.slane %v1618_v11, 1  ;;  %v1677_v47 = vrot.slane %v4265_v34, 1  ;;  %v1947_v22 = vsel %vm436_vm0, %v1944_v36, %v1946_v41 }
 0x11f   : > { %v1836_v29 = vadd.f32 %v1795_v17, %v1716_v14  ;;  %v1526_v15 = vsel %vm561_vm1, %v1524_v44, %v1525_v56  ;;  %v1796_v31 = vrot.slane %v1738_v28, 2  ;;  %v1797_v18 = vrot.slane %v4277_v62, 2  ;;  %v4341_v62 = vld [vmem:[%s2935_s24 + $0x178] sm:$0x3] }
 0x120   : > { %v2067_v48 = vsel %vm561_vm1, %v2064_v53, %v2066_v0  ;;  %v1565_v30 = vadd.f32 %v1526_v15, %v1445_v23  ;;  %v1890_v36 = vmul.f32 %v4297_v58, %v4284_v13  ;;  %v1678_v27 = vsel %vm436_vm0, %v1676_v5, %v1677_v47 }
 0x121   : > { %v1868_v16 = vadd.f32 %v1852_v40, %v1836_v29  ;;  %v1891_v20 = vmul.f32 %v4297_v58, %v4292_v57  ;;  %v2010_v53 = vmul.f32 %v4307_v60, %v4284_v13  ;;  %v4313_v63 = vmul.f32 %v4307_v60, %v4292_v57 }
 0x122   : > { %v1597_v21 = vadd.f32 %v1581_v32, %v1565_v30  ;;  %v1853_v40 = vmul.f32 %v4318_v9, %v4284_v13  ;;  %v1798_v8 = vsel %vm561_vm1, %v1796_v31, %v1797_v18  ;;  %v1948_v2 = vrot.slane %v1890_v36, 1 }
 0x123   : > { %v1988_v52 = vadd.f32 %v1947_v22, %v1868_v16  ;;  %v1949_v43 = vrot.slane %v1891_v20, 1  ;;  %v1348_v61 = vmul.f32 %v4223_v26, %v4107_v50  ;;  %v1310_v41 = vmul.f32 %v4242_v3, %v4066_v4 }
 0x124   : > { %v1717_v17 = vadd.f32 %v1678_v27, %v1597_v21  ;;  %v1468_v38 = vmul.f32 %v4232_v24, %v4107_v50  ;;  %v2068_v0 = vrot.slane %v2010_v53, 2  ;;  %v2069_v25 = vrot.slane %v4313_v63, 2 }
 0x125   : > { %v4325_v54 = vadd.f32 %v2067_v48, %v1988_v52  ;;  %v1407_v44 = vrot.slane %v1348_v61, 1  ;;  %v1620_v14 = vmul.f32 %v4259_v42, %v4205_v7  ;;  %v1950_v34 = vsel %vm436_vm0, %v1948_v2, %v1949_v43 }
 0x126   : > { %v1837_v32 = vadd.f32 %v1798_v8, %v1717_v17  ;;  %v1527_v11 = vrot.slane %v1468_v38, 2  ;;  %v1740_v4 = vmul.f32 %v4271_v6, %v4205_v7  ;;  %v1582_v5 = vmul.f32 %v4252_v10, %v4158_v33 }
 0x127   : > { %2617 = vst [vmem:[%s3090_s23 + $0xc8] sm:$0xff] %v4325_v54  ;;  %v1408_v59 = vsel %vm436_vm0, %v1405_v39, %v1407_v44  ;;  %v1679_v28 = vrot.slane %v1620_v14, 1  ;;  %v2070_v22 = vsel %vm561_vm1, %v2068_v0, %v2069_v25  ;;  %v1892_v31 = vmul.f32 %v4297_v58, %v4341_v62 }
 0x128   : > { %v1869_v50 = vadd.f32 %v1853_v40, %v1837_v32  ;;  %v1446_v29 = vadd.f32 %v1408_v59, %v1310_v41  ;;  %v1528_v23 = vsel %vm561_vm1, %v1525_v56, %v1527_v11  ;;  %v1799_v15 = vrot.slane %v1740_v4, 2 }
 0x129   : > { %v2012_v48 = vmul.f32 %v4307_v60, %v4341_v62  ;;  %v1349_v30 = vmul.f32 %v4223_v26, %v4155_v35  ;;  %v1680_v56 = vsel %vm436_vm0, %v1677_v47, %v1679_v28  ;;  %v1951_v36 = vrot.slane %v1892_v31, 1 }
 0x12a   : > { %v1989_v39 = vadd.f32 %v1950_v34, %v1869_v50  ;;  %v1566_v16 = vadd.f32 %v1528_v23, %v1446_v29  ;;  %v1311_v27 = vmul.f32 %v4242_v3, %v4155_v35  ;;  %v4358_v20 = vmul.f32 %v4223_v26, %v4158_v33  ;;  %v4387_v29 = vld [vmem:[%s2935_s24 + $0x180] sm:$0xff]  ;;  %v4390_v23 = vld [vmem:[%s2935_s24 + $0x188] sm:$0xff] }
 0x12b   : > { %v1409_v52 = vrot.slane %v1349_v30, 1  ;;  %v1469_v21 = vmul.f32 %v4232_v24, %v4155_v35  ;;  %v1800_v40 = vsel %vm561_vm1, %v1797_v18, %v1799_v15  ;;  %v1470_v47 = vmul.f32 %v4232_v24, %v4158_v33 }
 0x12c   : > { %v4360_v53 = vadd.f32 %v2070_v22, %v1989_v39  ;;  %v1598_v63 = vadd.f32 %v1582_v5, %v1566_v16  ;;  %v1410_v8 = vrot.slane %v4358_v20, 1  ;;  %v1854_v61 = vmul.f32 %v4318_v9, %v4292_v57 }
 0x12d   : > { %v2071_v17 = vrot.slane %v2012_v48, 2  ;;  %v1529_v41 = vrot.slane %v1469_v21, 2  ;;  %v1952_v38 = vsel %vm436_vm0, %v1949_v43, %v1951_v36  ;;  %v1530_v18 = vrot.slane %v1470_v47, 2 }
 0x12e   : > { %2618 = vst [vmem:[%s3090_s23 + $0xd0] sm:$0xff] %v4360_v53  ;;  %v1718_v2 = vadd.f32 %v1680_v56, %v1598_v63  ;;  %v1411_v35 = vsel %vm436_vm0, %v1409_v52, %v1410_v8  ;;  %v1621_v0 = vmul.f32 %v4259_v42, %v4284_v13  ;;  %v1583_v32 = vmul.f32 %v4252_v10, %v4284_v13 }
 0x12f   : > { %v1447_v14 = vadd.f32 %v1411_v35, %v1311_v27  ;;  %v1622_v11 = vmul.f32 %v4259_v42, %v4292_v57  ;;  %v1531_v34 = vsel %vm561_vm1, %v1529_v41, %v1530_v18  ;;  %v1741_v43 = vmul.f32 %v4271_v6, %v4284_v13 }
 0x130   : > { %v1838_v44 = vadd.f32 %v1800_v40, %v1718_v2  ;;  %v1681_v59 = vrot.slane %v1621_v0, 1  ;;  %v1742_v28 = vmul.f32 %v4271_v6, %v4292_v57  ;;  %v2072_v50 = vsel %vm561_vm1, %v2069_v25, %v2071_v17 }
 0x131   : > { %v1567_v5 = vadd.f32 %v1531_v34, %v1447_v14  ;;  %v1682_v22 = vrot.slane %v1622_v11, 1  ;;  %v1801_v15 = vrot.slane %v1741_v43, 2  ;;  %v1893_v39 = vmul.f32 %v4297_v58, %v4387_v29  ;;  %v4437_v43 = vld [vmem:[%s2935_s24 + $0x190] sm:$0x3] }
 0x132   : > { %v1870_v4 = vadd.f32 %v1854_v61, %v1838_v44  ;;  %v1802_v31 = vrot.slane %v1742_v28, 2  ;;  %v4396_v16 = vmul.f32 %v4297_v58, %v4390_v23  ;;  %v2013_v56 = vmul.f32 %v4307_v60, %v4387_v29 }
 0x133   : > { %v1599_v30 = vadd.f32 %v1583_v32, %v1567_v5  ;;  %v1683_v25 = vsel %vm436_vm0, %v1681_v59, %v1682_v22  ;;  %v1953_v27 = vrot.slane %v1893_v39, 1  ;;  %v4405_v63 = vmul.f32 %v4307_v60, %v4390_v23 }
 0x134   : > { %v1990_v48 = vadd.f32 %v1952_v38, %v1870_v4  ;;  %v1803_v36 = vsel %vm561_vm1, %v1801_v15, %v1802_v31  ;;  %v1954_v20 = vrot.slane %v4396_v16, 1  ;;  %v1855_v40 = vmul.f32 %v4318_v9, %v4387_v29 }
 0x135   : > { %v1719_v21 = vadd.f32 %v1683_v25, %v1599_v30  ;;  %v2073_v47 = vrot.slane %v2013_v56, 2  ;;  %v2074_v2 = vrot.slane %v4405_v63, 2  ;;  %v1351_v61 = vmul.f32 %v4223_v26, %v4205_v7 }
 0x136   : > { %v4407_v52 = vadd.f32 %v2072_v50, %v1990_v48  ;;  %v1471_v17 = vmul.f32 %v4232_v24, %v4205_v7  ;;  %v2157_v41 = vmul.f32 %v4215_v1, %v4215_v1  ;;  %v1312_v35 = vmul.f32 %v4242_v3, %v4158_v33 }
 0x137   : > { %v1839_v38 = vadd.f32 %v1803_v36, %v1719_v21  ;;  %v1955_v0 = vsel %vm436_vm0, %v1953_v27, %v1954_v20  ;;  %v1412_v44 = vrot.slane %v1351_v61, 1  ;;  %v1623_v32 = vmul.f32 %v4259_v42, %v4341_v62 }
 0x138   : > { %2619 = vst [vmem:[%s3090_s23 + $0xd8] sm:$0xff] %v4407_v52  ;;  %v1532_v14 = vrot.slane %v1471_v17, 2  ;;  %v2136_v7 = vadd.f32 %v4134_v45, %v4215_v1  ;;  %v1584_v34 = vmul.f32 %v4252_v10, %v4292_v57  ;;  %v1743_v59 = vmul.f32 %v4271_v6, %v4341_v62 }
 0x139   : > { %v1871_v11 = vadd.f32 %v1855_v40, %v1839_v38  ;;  %v2075_v33 = vsel %vm561_vm1, %v2073_v47, %v2074_v2  ;;  %v1413_v28 = vsel %vm436_vm0, %v1410_v8, %v1412_v44  ;;  %v1684_v50 = vrot.slane %v1623_v32, 1  ;;  %v2604_v32 = vld [vmem:[%s2935_s24 + $0x198] sm:$0xff] }
 0x13a   : > { %v1533_v4 = vsel %vm561_vm1, %v1530_v18, %v1532_v14  ;;  %v1448_v1 = vadd.f32 %v1413_v28, %v1312_v35  ;;  %v1804_v5 = vrot.slane %v1743_v59, 2  ;;  %v1895_v15 = vmul.f32 %v4297_v58, %v4437_v43 }
 0x13b   : > { %v1991_v45 = vadd.f32 %v1955_v0, %v1871_v11  ;;  %v2168_v39 = vadd.f32 %v4142_v51, %v2157_v41  ;;  %v2015_v48 = vmul.f32 %v4307_v60, %v4437_v43  ;;  %v1352_v30 = vmul.f32 %v4223_v26, %v4284_v13 }
 0x13c   : > { %v4449_v8 = vadd.f32 %v2136_v7, %v4360_v53  ;;  %v1568_v25 = vadd.f32 %v1533_v4, %v1448_v1  ;;  %v1856_v56 = vmul.f32 %v4318_v9, %v4390_v23  ;;  %v1685_v36 = vsel %vm436_vm0, %v1682_v22, %v1684_v50 }
 0x13d   : > { %v4451_v18 = vadd.f32 %v2075_v33, %v1991_v45  ;;  %v4458_v51 = vmul.f32 %v4223_v26, %v4292_v57  ;;  %v1414_v27 = vrot.slane %v1352_v30, 1  ;;  %v1472_v21 = vmul.f32 %v4232_v24, %v4284_v13  ;;  %v4485_v33 = vld [vmem:[%s2935_s24 + $0x1a0] sm:$0xff] }
 0x13e   : > { %v1600_v40 = vadd.f32 %v1584_v34, %v1568_v25  ;;  %v1805_v47 = vsel %vm561_vm1, %v1802_v31, %v1804_v5  ;;  %v1956_v61 = vrot.slane %v1895_v15, 1  ;;  %v1313_v17 = vmul.f32 %v4242_v3, %v4284_v13 }
 0x13f   : > { %2620 = vst [vmem:[%s3090_s23 + $0xe0] sm:$0xff] %v4451_v18  ;;  %v2076_v22 = vrot.slane %v2015_v48, 2  ;;  %v1415_v41 = vrot.slane %v4458_v51, 1  ;;  %v1473_v38 = vmul.f32 %v4232_v24, %v4292_v57  ;;  %v1534_v35 = vrot.slane %v1472_v21, 2 }
 0x140   : > { %v1720_v0 = vadd.f32 %v1685_v36, %v1600_v40  ;;  %v1585_v44 = vmul.f32 %v4252_v10, %v4387_v29  ;;  %v1624_v14 = vmul.f32 %v4259_v42, %v4387_v29  ;;  %v1625_v31 = vmul.f32 %v4259_v42, %v4390_v23 }
 0x141   : > { %v1416_v13 = vsel %vm436_vm0, %v1414_v27, %v1415_v41  ;;  %v1535_v7 = vrot.slane %v1473_v38, 2  ;;  %v1744_v11 = vmul.f32 %v4271_v6, %v4387_v29  ;;  %v4482_v34 = vmul.f32 %v4271_v6, %v4390_v23 }
 0x142   : > { %v1840_v59 = vadd.f32 %v1805_v47, %v1720_v0  ;;  %v1449_v28 = vadd.f32 %v1416_v13, %v1313_v17  ;;  %v1686_v4 = vrot.slane %v1624_v14, 1  ;;  %v1687_v50 = vrot.slane %v1625_v31, 1  ;;  %v2606_v13 = vld [vmem:[%s2935_s24 + $0x1a8] sm:$0x3] }
 0x143   : > { %v1957_v45 = vsel %vm436_vm0, %v1954_v20, %v1956_v61  ;;  %v1536_v1 = vsel %vm561_vm1, %v1534_v35, %v1535_v7  ;;  %v1806_v5 = vrot.slane %v1744_v11, 2  ;;  %v1807_v15 = vrot.slane %v4482_v34, 2 }
 0x144   : > { %v1872_v29 = vadd.f32 %v1856_v56, %v1840_v59  ;;  %v2077_v48 = vsel %vm561_vm1, %v2074_v2, %v2076_v22  ;;  %v1569_v30 = vadd.f32 %v1536_v1, %v1449_v28  ;;  %v1896_v25 = vmul.f32 %v4297_v58, %v2604_v32 }
 0x145   : > { %v1688_v36 = vsel %vm436_vm0, %v1686_v4, %v1687_v50  ;;  %v1897_v16 = vmul.f32 %v4297_v58, %v4485_v33  ;;  %v2016_v20 = vmul.f32 %v4307_v60, %v2604_v32  ;;  %v4502_v51 = vmul.f32 %v4307_v60, %v4485_v33 }
 0x146   : > { %v2159_v56 = vmul.f32 %v4360_v53, %v4360_v53  ;;  %v1992_v63 = vadd.f32 %v1957_v45, %v1872_v29  ;;  %v1601_v27 = vadd.f32 %v1585_v44, %v1569_v30  ;;  %v1857_v2 = vmul.f32 %v4318_v9, %v2604_v32 }
 0x147   : > { %v1808_v21 = vsel %vm561_vm1, %v1806_v5, %v1807_v15  ;;  %v1958_v40 = vrot.slane %v1896_v25, 1  ;;  %v1959_v47 = vrot.slane %v1897_v16, 1  ;;  %v1354_v61 = vmul.f32 %v4223_v26, %v4341_v62 }
 0x148   : > { %v2112_v17 = vadd.f32 %v2077_v48, %v1992_v63  ;;  %v1721_v22 = vadd.f32 %v1688_v36, %v1601_v27  ;;  %v1314_v38 = vmul.f32 %v4242_v3, %v4292_v57  ;;  %v1474_v53 = vmul.f32 %v4232_v24, %v4341_v62 }
 0x149   : > { %v2078_v35 = vrot.slane %v2016_v20, 2  ;;  %v2079_v0 = vrot.slane %v4502_v51, 2  ;;  %v1417_v44 = vrot.slane %v1354_v61, 1  ;;  %v1626_v14 = vmul.f32 %v4259_v42, %v4437_v43 }
 0x14a   : > { %v2169_v31 = vadd.f32 %v2168_v39, %v2159_v56  ;;  %v2161_v32 = vmul.f32 %v4451_v18, %v4451_v18  ;;  %2621 = vst [vmem:[%s3090_s23 + $0xe8] sm:$0xff] %v2112_v17  ;;  %v1841_v26 = vadd.f32 %v1808_v21, %v1721_v22  ;;  %v1537_v11 = vrot.slane %v1474_v53, 2 }
 0x14b   : > { %v1960_v3 = vsel %vm436_vm0, %v1958_v40, %v1959_v47  ;;  %v1418_v57 = vsel %vm436_vm0, %v1415_v41, %v1417_v44  ;;  %v1689_v24 = vrot.slane %v1626_v14, 1  ;;  %v1746_v62 = vmul.f32 %v4271_v6, %v4437_v43 }
 0x14c   : > { %v1873_v34 = vadd.f32 %v1857_v2, %v1841_v26  ;;  %v1450_v59 = vadd.f32 %v1418_v57, %v1314_v38  ;;  %v1538_v42 = vsel %vm561_vm1, %v1535_v7, %v1537_v11  ;;  %v1586_v39 = vmul.f32 %v4252_v10, %v4390_v23  ;;  %v2191_v57 = vld [vmem:[#allocation4] sm:$0x1] }
 0x14d   : > { %v2158_v28 = vmul.f32 %v4325_v54, %v4325_v54  ;;  %v2080_v4 = vsel %vm561_vm1, %v2078_v35, %v2079_v0  ;;  %v1809_v45 = vrot.slane %v1746_v62, 2  ;;  %v1898_v41 = vmul.f32 %v4297_v58, %v2606_v13 }
 0x14e   : > { %v2138_v1 = vadd.f32 %v4449_v8, %v4451_v18  ;;  %v1993_v6 = vadd.f32 %v1960_v3, %v1873_v34  ;;  %v1570_v43 = vadd.f32 %v1538_v42, %v1450_v59  ;;  %v1690_v5 = vsel %vm436_vm0, %v1687_v50, %v1689_v24 }
 0x14f   : > { %v2018_v7 = vmul.f32 %v4307_v60, %v2606_v13  ;;  %v2143_v10 = vadd.f32 %v4185_v12, %v4325_v54  ;;  %v2170_v23 = vadd.f32 %v2169_v31, %v2161_v32  ;;  %v2175_v30 = vadd.f32 %v4195_v19, %v2158_v28  ;;  %v2181_v13 = vld [vmem:[#allocation3] sm:$0x1] }
 0x150   : > { %v2113_v29 = vadd.f32 %v2080_v4, %v1993_v6  ;;  %v1602_v48 = vadd.f32 %v1586_v39, %v1570_v43  ;;  %v2160_v58 = vmul.f32 %v4407_v52, %v4407_v52  ;;  %v1810_v25 = vsel %vm561_vm1, %v1807_v15, %v1809_v45 }
 0x151   : > { %v1961_v8 = vrot.slane %v1898_v41, 1  ;;  %v1858_v60 = vmul.f32 %v4318_v9, %v4485_v33  ;;  %v2081_v12 = vrot.slane %v2018_v7, 2  ;;  %v2144_v54 = vadd.f32 %v2143_v10, %v4407_v52 }
 0x152   : > { %2622 = vst [vmem:[%s3090_s23 + $0xf0] sm:$0xff] %v2113_v29  ;;  %v2139_v18 = vadd.f32 %v2138_v1, %v2113_v29  ;;  %v2163_v36 = vmul.f32 %v2113_v29, %v2113_v29  ;;  %v1722_v50 = vadd.f32 %v1690_v5, %v1602_v48  ;;  %v2176_v56 = vadd.f32 %v2175_v30, %v2160_v58 }
 0x153   : > { %v1962_v51 = vsel %vm436_vm0, %v1959_v47, %v1961_v8  ;;  %v2162_v15 = vmul.f32 %v2112_v17, %v2112_v17  ;;  %v2082_v2 = vsel %vm561_vm1, %v2079_v0, %v2081_v12  ;;  %v2145_v21 = vadd.f32 %v2144_v54, %v2112_v17 }
 0x154   : > { %v2147_v16 = vadd.f32 %v2139_v18, %v3774_v46  ;;  %v2171_v19 = vadd.f32 %v2170_v23, %v2163_v36  ;;  %v1842_v20 = vadd.f32 %v1810_v25, %v1722_v50 }
 0x155   : > { %v2177_v9 = vadd.f32 %v2176_v56, %v2162_v15 }
 0x156   : > { %v1874_v63 = vadd.f32 %v1858_v60, %v1842_v20  ;;  %v2179_v27 = vadd.f32 %v2171_v19, %v3783_v49 }
 0x158   : > { %v1994_v40 = vadd.f32 %v1962_v51, %v1874_v63 }
 0x15a   : > { %v2114_v33 = vadd.f32 %v2082_v2, %v1994_v40 }
 0x15c   : > { %2623 = vst [vmem:[%s3090_s23 + $0xf8] sm:$0xff] %v2114_v33  ;;  %v2146_v61 = vadd.f32 %v2145_v21, %v2114_v33  ;;  %v2164_v52 = vmul.f32 %v2114_v33, %v2114_v33 }
 0x15e   : > { %v2148_v46 = vadd.f32 %v2146_v61, %v3820_v55  ;;  %v2178_v22 = vadd.f32 %v2177_v9, %v2164_v52 }
 0x160   : > { %v2182_v38 = vadd.f32 %v2148_v46, %v2147_v16  ;;  %v2180_v47 = vadd.f32 %v2178_v22, %v3831_v37 }
 0x162   : > { %v2183_v53 = vrot.slane %v2182_v38, 4  ;;  %v2192_v35 = vadd.f32 %v2180_v47, %v2179_v27 }
 0x164   : > { %v2184_v44 = vadd.f32 %v2183_v53, %v2182_v38  ;;  %v2193_v14 = vrot.slane %v2192_v35, 4 }
 0x166   : > { %v2185_v49 = vrot.slane %v2184_v44, 2  ;;  %v2194_v31 = vadd.f32 %v2193_v14, %v2192_v35 }
 0x168   : > { %v2186_v0 = vadd.f32 %v2185_v49, %v2184_v44  ;;  %v2195_v17 = vrot.slane %v2194_v31, 2 }
 0x16a   : > { %v2187_v32 = vrot.slane %v2186_v0, 1  ;;  %v2196_v26 = vadd.f32 %v2195_v17, %v2194_v31 }
 0x16c   : > { %v2188_v11 = vadd.f32 %v2187_v32, %v2186_v0  ;;  %v2197_v3 = vrot.slane %v2196_v26, 1 }
 0x16e   : > { %v2189_v24 = vadd.f32 %v2188_v11, %v2181_v13  ;;  %v2198_v55 = vadd.f32 %v2197_v3, %v2196_v26 }
 0x170   : > { %2190 = vst [vmem:[#allocation3] sm:$0x1] %v2189_v24  ;;  %v2199_v62 = vadd.f32 %v2198_v55, %v2191_v57 }
 0x172   : > { %2200 = vst [vmem:[#allocation4] sm:$0x1] %v2199_v62 }
 0x173 PF: > { %p2624_p1 = scmp.ne.s32.totalorder %s2812_s19, 1 }
 0x174   : > { %p2625_p2 = scmp.ne.s32.totalorder (!%p2624_p1), %s2808_s18, 0 }
 0x175   : > { %2204 = sbr.rel (%p2624_p1) target bundleno = 442 (0x1ba), region = 48 }
 0x17c   : > { %2208 = sbr.rel (%p2625_p2) target bundleno = 409 (0x199), region = 52  ;;  %v2209_v37 = vld [vmem:[#allocation3] sm:$0x1] (!%p2625_p2)  ;;  %v2211_v34 = vld [vmem:[#allocation4] sm:$0x1] (!%p2625_p2) }
 0x17d   : > { %v2210_v59 = vmul.f32 (!%p2625_p2), 0.001953125, %v2209_v37  ;;  %v2212_v42 = vmul.f32 (!%p2625_p2), 0.001953125, %v2211_v34  ;;  %v2218_v41 = vld [vmem:[%s4765_s2] sm:$0x1] (!%p2625_p2) }
 0x17e   : > { %v2222_v1 = vld [vmem:[%s4765_s2] sm:$0x1] (!%p2625_p2) }
 0x17f   : > { %v2213_v39 = vmul.f32 (!%p2625_p2), %v2210_v59, %v2210_v59  ;;  %v2221_v7 = vld [vmem:[%s4766_s3] sm:$0x1] (!%p2625_p2) }
 0x181   : > { %v2214_v28 = vsub.f32 (!%p2625_p2), %v2212_v42, %v2213_v39 }
 0x183   : > { %v2215_v4 = vmax.f32 %v2214_v28, 0.0 }
 0x185   : > { %v2216_v45 = vadd.f32 1e-05, %v2215_v4 }
 0x187   : > { %2728 = vrsqrt.f32 %v2216_v45 }
 0x191   : > { %v2729_v6 = vpop.eup %2728 }
 0x192   : > { %v2219_v43 = vmul.f32 %v2729_v6, %v2218_v41  ;;  %v2223_v5 = vmul.f32 %v2729_v6, %v2222_v1 }
 0x194   : > { %2220 = vst [vmem:[#allocation5] sm:$0x1] %v2219_v43  ;;  %v2224_v10 = vmul.f32 %v2223_v5, %v2210_v59 }
 0x196   : > { %v2225_v23 = vsub.f32 %v2221_v7, %v2224_v10 }
 0x198   : > { %2226 = vst [vmem:[#allocation6] sm:$0x1] %v2225_v23 }
 0x199 PF: > { %s2626_s10 = sshll.u32 %s2808_s18, 8 }
 0x19a   : > { %s4569_s11 = scalar_lea.vmem [#allocation2], %s2626_s10 }
 0x19b   : > { %v4564_v29 = vld [vmem:[#allocation5] ss:$0 sm:$0xff]  ;;  %v2232_v58 = vld [vmem:[%s4569_s11 + $0x8] sm:$0xff]  ;;  %v2233_v25 = vld [vmem:[%s4569_s11 + $0x10] sm:$0xff] }
 0x19c   : > { %v2231_v30 = vld [vmem:[%s4569_s11] sm:$0xff]  ;;  %v2270_v18 = vmul.f32 %v4564_v29, %v2232_v58  ;;  %v2271_v36 = vmul.f32 %v4564_v29, %v2233_v25  ;;  %v2234_v50 = vld [vmem:[%s4569_s11 + $0x18] sm:$0xff]  ;;  %v2236_v12 = vld [vmem:[%s4569_s11 + $0x28] sm:$0xff] }
 0x19d   : > { %v2269_v8 = vmul.f32 %v4564_v29, %v2231_v30  ;;  %v2235_v60 = vld [vmem:[%s4569_s11 + $0x20] sm:$0xff]  ;;  %v2272_v54 = vmul.f32 %v4564_v29, %v2234_v50  ;;  %v2274_v19 = vmul.f32 %v4564_v29, %v2236_v12  ;;  %v2237_v20 = vld [vmem:[%s4569_s11 + $0x30] sm:$0xff]  ;;  %v2238_v51 = vld [vmem:[%s4569_s11 + $0x38] sm:$0xff] }
 0x19e   : > { %v2273_v16 = vmul.f32 %v4564_v29, %v2235_v60  ;;  %v2275_v27 = vmul.f32 %v4564_v29, %v2237_v20  ;;  %v2276_v9 = vmul.f32 %v4564_v29, %v2238_v51  ;;  %v2239_v33 = vld [vmem:[%s4569_s11 + $0x40] sm:$0xff]  ;;  %v2240_v61 = vld [vmem:[%s4569_s11 + $0x48] sm:$0xff]  ;;  %v2241_v52 = vld [vmem:[%s4569_s11 + $0x50] sm:$0xff] }
 0x19f   : > { %v4567_v48 = vld [vmem:[#allocation6] ss:$0 sm:$0xff]  ;;  %v2242_v53 = vld [vmem:[%s4569_s11 + $0x58] sm:$0xff]  ;;  %v2244_v44 = vld [vmem:[%s4569_s11 + $0x68] sm:$0xff]  ;;  %v2277_v26 = vmul.f32 %v4564_v29, %v2239_v33  ;;  %v2278_v13 = vmul.f32 %v4564_v29, %v2240_v61  ;;  %v2279_v11 = vmul.f32 %v4564_v29, %v2241_v52 }
 0x1a0   : > { %v2307_v56 = vadd.f32 %v4567_v48, %v2269_v8  ;;  %v2308_v15 = vadd.f32 %v4567_v48, %v2270_v18  ;;  %v2309_v63 = vadd.f32 %v4567_v48, %v2271_v36  ;;  %v2310_v2 = vadd.f32 %v4567_v48, %v2272_v54  ;;  %v2243_v35 = vld [vmem:[%s4569_s11 + $0x60] sm:$0xff]  ;;  %v2245_v17 = vld [vmem:[%s4569_s11 + $0x70] sm:$0xff]  ;;  %v2246_v3 = vld [vmem:[%s4569_s11 + $0x78] sm:$0xff] }
 0x1a1   : > { %v2311_v21 = vadd.f32 %v4567_v48, %v2273_v16  ;;  %v2312_v40 = vadd.f32 %v4567_v48, %v2274_v19  ;;  %v2313_v47 = vadd.f32 %v4567_v48, %v2275_v27  ;;  %v2314_v0 = vadd.f32 %v4567_v48, %v2276_v9  ;;  %v2247_v41 = vld [vmem:[%s4569_s11 + $0x80] sm:$0xff]  ;;  %v2248_v1 = vld [vmem:[%s4569_s11 + $0x88] sm:$0xff]  ;;  %v2249_v6 = vld [vmem:[%s4569_s11 + $0x90] sm:$0xff] }
 0x1a2   : > { %v2339_v46 = vmax.f32 %v2307_v56, 0.0  ;;  %v2340_v22 = vmax.f32 %v2308_v15, 0.0  ;;  %v2341_v38 = vmax.f32 %v2309_v63, 0.0  ;;  %v2342_v14 = vmax.f32 %v2310_v2, 0.0  ;;  %v2250_v23 = vld [vmem:[%s4569_s11 + $0x98] sm:$0xff]  ;;  %v2251_v30 = vld [vmem:[%s4569_s11 + $0xa0] sm:$0xff] }
 0x1a3   : > { %v2343_v49 = vmax.f32 %v2311_v21, 0.0  ;;  %v2344_v31 = vmax.f32 %v2312_v40, 0.0  ;;  %v2345_v32 = vmax.f32 %v2313_v47, 0.0  ;;  %v2346_v57 = vmax.f32 %v2314_v0, 0.0  ;;  %v2252_v58 = vld [vmem:[%s4569_s11 + $0xa8] sm:$0xff]  ;;  %v2253_v50 = vld [vmem:[%s4569_s11 + $0xb0] sm:$0xff] }
 0x1a4   : > { %2371 = vst [vmem:[%s2937_s27] sm:$0xff] %v2339_v46  ;;  %2372 = vst [vmem:[%s2937_s27 + $0x8] sm:$0xff] %v2340_v22  ;;  %v2280_v24 = vmul.f32 %v4564_v29, %v2242_v53  ;;  %v2281_v55 = vmul.f32 %v4564_v29, %v2243_v35  ;;  %v2282_v62 = vmul.f32 %v4564_v29, %v2244_v44  ;;  %v2254_v19 = vld [vmem:[%s4569_s11 + $0xb8] sm:$0xff]  ;;  %v2255_v52 = vld [vmem:[%s4569_s11 + $0xc0] sm:$0xff] }
 0x1a5   : > { %2373 = vst [vmem:[%s2937_s27 + $0x10] sm:$0xff] %v2341_v38  ;;  %2374 = vst [vmem:[%s2937_s27 + $0x18] sm:$0xff] %v2342_v14  ;;  %v2315_v37 = vadd.f32 %v4567_v48, %v2277_v26  ;;  %v2316_v34 = vadd.f32 %v4567_v48, %v2278_v13  ;;  %v2317_v59 = vadd.f32 %v4567_v48, %v2279_v11  ;;  %v2256_v46 = vld [vmem:[%s4569_s11 + $0xc8] sm:$0xff]  ;;  %v2257_v22 = vld [vmem:[%s4569_s11 + $0xd0] sm:$0xff] }
 0x1a6   : > { %2375 = vst [vmem:[%s2937_s27 + $0x20] sm:$0xff] %v2343_v49  ;;  %2376 = vst [vmem:[%s2937_s27 + $0x28] sm:$0xff] %v2344_v31  ;;  %v2283_v42 = vmul.f32 %v4564_v29, %v2245_v17  ;;  %v2318_v39 = vadd.f32 %v4567_v48, %v2280_v24  ;;  %v2319_v28 = vadd.f32 %v4567_v48, %v2281_v55  ;;  %v2258_v44 = vld [vmem:[%s4569_s11 + $0xd8] sm:$0xff]  ;;  %v2259_v14 = vld [vmem:[%s4569_s11 + $0xe0] sm:$0xff] }
 0x1a7   : > { %2377 = vst [vmem:[%s2937_s27 + $0x30] sm:$0xff] %v2345_v32  ;;  %2378 = vst [vmem:[%s2937_s27 + $0x38] sm:$0xff] %v2346_v57  ;;  %v2320_v4 = vadd.f32 %v4567_v48, %v2282_v62  ;;  %v2284_v45 = vmul.f32 %v4564_v29, %v2246_v3  ;;  %v2347_v43 = vmax.f32 %v2315_v37, 0.0  ;;  %v2348_v5 = vmax.f32 %v2316_v34, 0.0  ;;  %v2260_v49 = vld [vmem:[%s4569_s11 + $0xe8] sm:$0xff]  ;;  %v2261_v26 = vld [vmem:[%s4569_s11 + $0xf0] sm:$0xff] }
 0x1a8   : > { %v2349_v7 = vmax.f32 %v2317_v59, 0.0  ;;  %v2321_v10 = vadd.f32 %v4567_v48, %v2283_v42  ;;  %v2350_v25 = vmax.f32 %v2318_v39, 0.0  ;;  %v2351_v8 = vmax.f32 %v2319_v28, 0.0  ;;  %v2262_v24 = vld [vmem:[%s4569_s11 + $0xf8] sm:$0xff] }
 0x1a9   : > { %v2352_v18 = vmax.f32 %v2320_v4, 0.0  ;;  %v2322_v36 = vadd.f32 %v4567_v48, %v2284_v45  ;;  %2379 = vst [vmem:[%s2937_s27 + $0x40] sm:$0xff] %v2347_v43  ;;  %2380 = vst [vmem:[%s2937_s27 + $0x48] sm:$0xff] %v2348_v5  ;;  %v2285_v12 = vmul.f32 %v4564_v29, %v2247_v41  ;;  %v2286_v54 = vmul.f32 %v4564_v29, %v2248_v1 }
 0x1aa   : > { %2381 = vst [vmem:[%s2937_s27 + $0x50] sm:$0xff] %v2349_v7  ;;  %v2353_v60 = vmax.f32 %v2321_v10, 0.0  ;;  %v2287_v16 = vmul.f32 %v4564_v29, %v2249_v6  ;;  %2382 = vst [vmem:[%s2937_s27 + $0x58] sm:$0xff] %v2350_v25  ;;  %v2288_v51 = vmul.f32 %v4564_v29, %v2250_v23  ;;  %v2289_v56 = vmul.f32 %v4564_v29, %v2251_v30 }
 0x1ab   : > { %2383 = vst [vmem:[%s2937_s27 + $0x60] sm:$0xff] %v2351_v8  ;;  %2384 = vst [vmem:[%s2937_s27 + $0x68] sm:$0xff] %v2352_v18  ;;  %v2354_v20 = vmax.f32 %v2322_v36, 0.0  ;;  %v2290_v15 = vmul.f32 %v4564_v29, %v2252_v58  ;;  %v2323_v63 = vadd.f32 %v4567_v48, %v2285_v12  ;;  %v2324_v27 = vadd.f32 %v4567_v48, %v2286_v54 }
 0x1ac   : > { %2385 = vst [vmem:[%s2937_s27 + $0x70] sm:$0xff] %v2353_v60  ;;  %v2325_v2 = vadd.f32 %v4567_v48, %v2287_v16  ;;  %v2291_v21 = vmul.f32 %v4564_v29, %v2253_v50  ;;  %v2326_v40 = vadd.f32 %v4567_v48, %v2288_v51  ;;  %v2327_v9 = vadd.f32 %v4567_v48, %v2289_v56 }
 0x1ad   : > { %2386 = vst [vmem:[%s2937_s27 + $0x78] sm:$0xff] %v2354_v20  ;;  %v2328_v33 = vadd.f32 %v4567_v48, %v2290_v15  ;;  %v2292_v61 = vmul.f32 %v4564_v29, %v2254_v19  ;;  %v2355_v38 = vmax.f32 %v2323_v63, 0.0  ;;  %v2356_v47 = vmax.f32 %v2324_v27, 0.0 }
 0x1ae   : > { %v2357_v53 = vmax.f32 %v2325_v2, 0.0  ;;  %v2329_v35 = vadd.f32 %v4567_v48, %v2291_v21  ;;  %v2358_v31 = vmax.f32 %v2326_v40, 0.0  ;;  %v2359_v0 = vmax.f32 %v2327_v9, 0.0 }
 0x1af   : > { %v2360_v17 = vmax.f32 %v2328_v33, 0.0  ;;  %v2330_v32 = vadd.f32 %v4567_v48, %v2292_v61  ;;  %2387 = vst [vmem:[%s2937_s27 + $0x80] sm:$0xff] %v2355_v38  ;;  %2388 = vst [vmem:[%s2937_s27 + $0x88] sm:$0xff] %v2356_v47  ;;  %v2293_v11 = vmul.f32 %v4564_v29, %v2255_v52  ;;  %v2294_v3 = vmul.f32 %v4564_v29, %v2256_v46 }
 0x1b0   : > { %2389 = vst [vmem:[%s2937_s27 + $0x90] sm:$0xff] %v2357_v53  ;;  %v2361_v13 = vmax.f32 %v2329_v35, 0.0  ;;  %v2295_v57 = vmul.f32 %v4564_v29, %v2257_v22  ;;  %2390 = vst [vmem:[%s2937_s27 + $0x98] sm:$0xff] %v2358_v31  ;;  %v2296_v62 = vmul.f32 %v4564_v29, %v2258_v44  ;;  %v2297_v37 = vmul.f32 %v4564_v29, %v2259_v14 }
 0x1b1   : > { %2391 = vst [vmem:[%s2937_s27 + $0xa0] sm:$0xff] %v2359_v0  ;;  %2392 = vst [vmem:[%s2937_s27 + $0xa8] sm:$0xff] %v2360_v17  ;;  %v2362_v55 = vmax.f32 %v2330_v32, 0.0  ;;  %v2298_v34 = vmul.f32 %v4564_v29, %v2260_v49  ;;  %v2331_v59 = vadd.f32 %v4567_v48, %v2293_v11  ;;  %v2332_v42 = vadd.f32 %v4567_v48, %v2294_v3 }
 0x1b2   : > { %2393 = vst [vmem:[%s2937_s27 + $0xb0] sm:$0xff] %v2361_v13  ;;  %v2333_v39 = vadd.f32 %v4567_v48, %v2295_v57  ;;  %v2299_v28 = vmul.f32 %v4564_v29, %v2261_v26  ;;  %v2334_v4 = vadd.f32 %v4567_v48, %v2296_v62  ;;  %v2335_v45 = vadd.f32 %v4567_v48, %v2297_v37 }
 0x1b3   : > { %2394 = vst [vmem:[%s2937_s27 + $0xb8] sm:$0xff] %v2362_v55  ;;  %v2336_v41 = vadd.f32 %v4567_v48, %v2298_v34  ;;  %v2300_v1 = vmul.f32 %v4564_v29, %v2262_v24  ;;  %v2363_v6 = vmax.f32 %v2331_v59, 0.0  ;;  %v2364_v43 = vmax.f32 %v2332_v42, 0.0 }
 0x1b4   : > { %v2365_v5 = vmax.f32 %v2333_v39, 0.0  ;;  %v2337_v7 = vadd.f32 %v4567_v48, %v2299_v28  ;;  %v2366_v10 = vmax.f32 %v2334_v4, 0.0  ;;  %v2367_v23 = vmax.f32 %v2335_v45, 0.0 }
 0x1b5   : > { %v2368_v30 = vmax.f32 %v2336_v41, 0.0  ;;  %v2338_v58 = vadd.f32 %v4567_v48, %v2300_v1  ;;  %2395 = vst [vmem:[%s2937_s27 + $0xc0] sm:$0xff] %v2363_v6  ;;  %2396 = vst [vmem:[%s2937_s27 + $0xc8] sm:$0xff] %v2364_v43 }
 0x1b6   : > { %2397 = vst [vmem:[%s2937_s27 + $0xd0] sm:$0xff] %v2365_v5  ;;  %v2369_v25 = vmax.f32 %v2337_v7, 0.0  ;;  %2398 = vst [vmem:[%s2937_s27 + $0xd8] sm:$0xff] %v2366_v10 }
 0x1b7   : > { %2399 = vst [vmem:[%s2937_s27 + $0xe0] sm:$0xff] %v2367_v23  ;;  %2400 = vst [vmem:[%s2937_s27 + $0xe8] sm:$0xff] %v2368_v30  ;;  %v2370_v29 = vmax.f32 %v2338_v58, 0.0 }
 0x1b8   : > { %2401 = vst [vmem:[%s2937_s27 + $0xf0] sm:$0xff] %v2369_v25 }
 0x1b9   : > { %2402 = vst [vmem:[%s2937_s27 + $0xf8] sm:$0xff] %v2370_v29 }
 0x1ba PF: > { %s2411_s12 = smul.u32 %s2808_s18, %s2812_s19  ;;  %s2419_s13 = sshll.u32 %s2937_s27, 4  ;;  %s4702_s13 = int_to_ptr.vmem [resolvable:$true] %s2419_s13 }
 0x1bb   : > { %s4711_s5 = scalar_lea.sflag [#allocation8], %s269_s8  ;;  %s2730_s6 = scalar_lea.vmem %s4702_s13, 4096 }
 0x1bc   : > { %s2634_s14 = sshll.u32 %s2411_s12, 12  ;;  %p2731_p3 = scmp.ne.s32.totalorder %s4702_s13, %s2730_s6 }
 0x1bd   : > { %s4707_s30 = scalar_lea.hbm %s4767_s4, %s2634_s14  ;;  %s2827_s18 = smov [#allocation7]  }
 0x1be   : > { %p2732_p4 = pnand %p2731_p3, %p2908_p6  ;;  %s2734_s19 = sshll.u32 %s2827_s18, 4  ;;  %s2735_s19 = int_to_ptr.vmem [resolvable:$false] %s2734_s19 }
 0x1bf   : > { %s2736_s27 = scalar_lea.vmem %s2735_s19, 8192  ;;  %p2737_p7 = scmp.lt.s32.totalorder %s4702_s13, %s2735_s19 }
 0x1c0   : > { %p2733_p5 = pneg %p2732_p4  ;;  %p2738_p9 = scmp.lt.s32.totalorder %s2736_s27, %s2730_s6 }
 0x1c2   : > { %p2739_p10 = por %p2738_p9, %p2737_p7 }
 0x1c4   : > { %p2740_p11 = pnand %p2739_p10, %p2733_p5 }
 0x1c6   : > { %2743 = shalt.err (!%p2740_p11)
}
 0x1c7   : > { %s2744_s8 = scalar_lea.hbm %s4707_s30, 4096  ;;  %s2748_s11 = scalar_lea.hbm %s4767_s4, 8192 }
 0x1c8   : > { %p2745_p12 = scmp.ne.s32.totalorder %s4707_s30, %s2744_s8  ;;  %p2749_p1 = scmp.lt.u32.totalorder %s4707_s30, %s4767_s4 }
 0x1c9   : > { %p2750_p2 = scmp.lt.u32.totalorder %s2748_s11, %s2744_s8  ;;  %p2752_p4 = scmp.lt.u32.totalorder %s2744_s8, %s4707_s30 }
 0x1ca   : > { %p2746_p13 = pnand %p2745_p12, %p2908_p6 }
 0x1cb   : > { %p2751_p3 = por %p2750_p2, %p2749_p1 }
 0x1cc   : > { %p2747_p0 = pneg %p2746_p13 }
 0x1cd   : > { %p2753_p5 = por %p2752_p4, %p2751_p3 }
 0x1cf   : > { %p2754_p7 = pnand %p2753_p5, %p2747_p0 }
 0x1d1   : > { %2757 = shalt.err (!%p2754_p7)
}
 0x1d2   : > { %s2828_s24 = smov 128   ;;  %s2829_s23 = smov 8  }
 0x1d3   : > { %2636 = dma.vmem_to_hbm [thread:$0]  (%p2908_p6), %s4702_s13, 4096, %s4707_s30, %s4711_s5, %s2828_s24, %s2828_s24, %s2829_s23  }
 0x1d4 PF: > { %p2642_p9 = scmp.ge.s32.totalorder %s2824_s22, 2  ;;  %s2434_s6 = sand.u32 1, %s2796_s15  }
 0x1d5   : > { %s2435_s18 = scalar_lea.sflag [#allocation8], %s2434_s6 }
 0x1d6   : > { %p2639_p10 = pnand %p2642_p9, %p2915_p8 }
 0x1d8   : > { %2791 = dma.done.wait (!%p2639_p10), %s2435_s18, 4096  }
 0x1d9   : > { %2793 = vsyncadd (!%p2639_p10), %s2435_s18, 4294963200  ;;  %s17_s22 = sadd.s32 1, %s2824_s22   ;;  %s4770_s15 = smov %s2800_s16 }
 0x1da   : > { %p14_p11 = scmp.ge.s32.totalorder %s17_s22, 6   ;;  %s4771_s16 = smov %s2804_s17 }
 0x1db   : > { %s4772_s17 = smov %s2924_s7  ;;  %s4773_s18 = smov %s2816_s20 }
 0x1dc   : > { %s4774_s19 = smov %s2820_s21  ;;  %s4775_s20 = smov %s4778_s25 }
 0x1dd   : > { %s4776_s21 = smov %s4782_s26  ;;  %16 = sbr.rel (!%p14_p11) target bundleno = 5 (0x5), region = 102 }
 0x1e4   :  { %2440 = vsyncpa [#allocation8], 1 }
 0x1e5   :  { %2442 = vsyncpa [#allocation8 + $0x1], 1 }

</bundles_post_ra>
